<compile_context>
chip_gen: v5e
topology: v5e:2x2
jax: 0.10.0
libtpu: 0.0.40
codegen_flags: <defaults>
</compile_context>

<pallas_src>
import numpy as np
import jax
import jax.numpy as jnp
from jax.experimental import pallas as pl
from jax.experimental.pallas import tpu as pltpu  # noqa: F401  (TPU backend)

BOARD = 8          # board_size
NUM_BOARDS = 4     # num_boards (input channels)
NUM_ACTIONS = 6
C1 = 16            # conv1 out channels
C2 = 8             # cnn_out_channels
HIDDEN = 256
BATCH = 2


def dqn_fused_kernel(x_ref, shift_ref, w1s_ref, b1_ref, w2s_ref, b2_ref,
                     g_ref, bl1_ref, wl2_ref, bl2_ref, out_ref):
    # x_ref:     (Cin, L)          activations, spatial-on-lanes, L = B*H*W
    # shift_ref: (9, L, L)         0/1 shift+edge-mask matrices, tap k = dh*3+dw
    # w1s_ref:   (9*C1, Cin)       conv1 weights, taps stacked on rows
    # b1_ref:    (C1, 1)
    # w2s_ref:   (9*C2, C1)        conv2 weights, taps stacked on rows
    # b2_ref:    (C2, 1)
    # g_ref:     (C2, HW, HIDDEN)  wl1 with the CHW-flatten permutation absorbed
    # bl1_ref:   (1, HIDDEN)
    # wl2_ref:   (HIDDEN, A)
    # bl2_ref:   (1, A)
    # out_ref:   (B, A)
    _, L = x_ref.shape
    c1 = b1_ref.shape[0]
    c2 = b2_ref.shape[0]
    hw = g_ref.shape[1]
    nb = L // hw                       # batch size

    x = x_ref[...]                     # (Cin, L)

    # ---- conv1: one stacked-tap weight matmul, then 9 shift+mask matmuls ----
    z1 = jnp.dot(w1s_ref[...], x, preferred_element_type=jnp.float32)   # (9*C1, L)
    acc1 = jnp.zeros((c1, L), dtype=jnp.float32)
    for k in range(9):
        acc1 = acc1 + jnp.dot(z1[k * c1:(k + 1) * c1, :], shift_ref[k],
                              preferred_element_type=jnp.float32)
    h1 = jnp.maximum(acc1 + b1_ref[...], 0.0)                           # (C1, L)

    # ---- conv2 ----
    z2 = jnp.dot(w2s_ref[...], h1, preferred_element_type=jnp.float32)  # (9*C2, L)
    acc2 = jnp.zeros((c2, L), dtype=jnp.float32)
    for k in range(9):
        acc2 = acc2 + jnp.dot(z2[k * c2:(k + 1) * c2, :], shift_ref[k],
                              preferred_element_type=jnp.float32)
    h2 = jnp.maximum(acc2 + b2_ref[...], 0.0)                           # (C2, L)

    # ---- MLP head (flatten permutation already folded into g_ref) ----
    hid = [bl1_ref[...] for _ in range(nb)]          # each (1, HIDDEN)
    for ch in range(c2):
        gmat = g_ref[ch]                             # (HW, HIDDEN)
        for b in range(nb):
            hid[b] = hid[b] + jnp.dot(h2[ch:ch + 1, b * hw:(b + 1) * hw], gmat,
                                      preferred_element_type=jnp.float32)
    for b in range(nb):
        hb = jnp.maximum(hid[b], 0.0)                # (1, HIDDEN)
        q = jnp.dot(hb, wl2_ref[...],
                    preferred_element_type=jnp.float32) + bl2_ref[...]  # (1, A)
        out_ref[pl.ds(b, 1), :] = q


def _build_shift_mask_mats(batch, h, w):
    """mats[k] is a 0/1 (L, L) matrix with (Z @ mats[k])[:, p] = Z[:, p + off_k]
    whenever 3x3 tap k = dh*3+dw stays on the board at output position p
    (p = b*H*W + r*W + c), and 0 otherwise (i.e. the conv's zero padding)."""
    L = batch * h * w
    mats = np.zeros((9, L, L), dtype=np.float32)
    for dh in range(3):
        for dw in range(3):
            k = dh * 3 + dw
            dr, dc = dh - 1, dw - 1
            for b in range(batch):
                for r in range(h):
                    for c in range(w):
                        rr, cc = r + dr, c + dc
                        if 0 <= rr < h and 0 <= cc < w:
                            p = b * h * w + r * w + c
                            q = b * h * w + rr * w + cc
                            mats[k, q, p] = 1.0
    return jnp.asarray(mats)


def prepare_params(params, batch, board=BOARD):
    """One-time re-layout of PyTorch-style parameters for the fused kernel."""
    w1, b1, w2, b2, wl1, bl1, wl2, bl2 = params
    c1, cin = w1.shape[0], w1.shape[1]
    c2 = w2.shape[0]
    hidden = wl1.shape[0]
    hw = board * board
    a = wl2.shape[0]

    shift = _build_shift_mask_mats(batch, board, board)             # (9, L, L)
    w1s = jnp.transpose(w1, (2, 3, 0, 1)).reshape(9 * c1, cin)      # (9*C1, Cin)
    w2s = jnp.transpose(w2, (2, 3, 0, 1)).reshape(9 * c2, c1)       # (9*C2, C1)
    # g[c2, s, j] = wl1[j, c2*HW + s]  (absorbs the NCHW .view flatten order)
    g = jnp.transpose(wl1, (1, 0)).reshape(c2, hw, hidden)          # (C2, HW, HID)
    return (shift, w1s, b1.reshape(c1, 1), w2s, b2.reshape(c2, 1),
            g, bl1.reshape(1, hidden), jnp.transpose(wl2, (1, 0)),
            bl2.reshape(1, a))


def dqn_forward(x, prep):
    """x: (B, num_boards, board, board) float32, NCHW like the PyTorch module."""
    shift, w1s, b1c, w2s, b2c, g, bl1r, wl2m, bl2r = prep
    B, cin, H, W = x.shape
    # Only per-call re-layout: NCHW -> (Cin, B*H*W)  (spatial-on-lanes, lane-dense)
    x_sl = jnp.transpose(x, (1, 0, 2, 3)).reshape(cin, B * H * W)
    return pl.pallas_call(
        dqn_fused_kernel,
        out_shape=jax.ShapeDtypeStruct((B, wl2m.shape[1]), jnp.float32),
    )(x_sl, shift, w1s, b1c, w2s, b2c, g, bl1r, wl2m, bl2r)


def ref_forward(x, params):
    """Pure-JAX reference matching the PyTorch module exactly."""
    w1, b1, w2, b2, wl1, bl1, wl2, bl2 = params
    dn = ("NCHW", "OIHW", "NCHW")
    h1 = jax.nn.relu(jax.lax.conv_general_dilated(
        x, w1, (1, 1), "SAME", dimension_numbers=dn) + b1[None, :, None, None])
    h2 = jax.nn.relu(jax.lax.conv_general_dilated(
        h1, w2, (1, 1), "SAME", dimension_numbers=dn) + b2[None, :, None, None])
    f = h2.reshape(x.shape[0], -1)
    y1 = jax.nn.relu(f @ wl1.T + bl1)
    return y1 @ wl2.T + bl2


def init_params(key):
    ks = jax.random.split(key, 8)

    def u(k, shape, scale):
        return jax.random.uniform(k, shape, jnp.float32, -scale, scale)

    w1 = u(ks[0], (C1, NUM_BOARDS, 3, 3), 0.2)
    b1 = u(ks[1], (C1,), 0.1)
    w2 = u(ks[2], (C2, C1, 3, 3), 0.1)
    b2 = u(ks[3], (C2,), 0.1)
    wl1 = u(ks[4], (HIDDEN, C2 * BOARD * BOARD), 0.05)
    bl1 = u(ks[5], (HIDDEN,), 0.05)
    wl2 = u(ks[6], (NUM_ACTIONS, HIDDEN), 0.05)
    bl2 = u(ks[7], (NUM_ACTIONS,), 0.05)
    return (w1, b1, w2, b2, wl1, bl1, wl2, bl2)


if __name__ == "__main__":
    key = jax.random.PRNGKey(0)
    pkey, xkey = jax.random.split(key)
    params = init_params(pkey)
    x = jax.random.uniform(xkey, (BATCH, NUM_BOARDS, BOARD, BOARD), jnp.float32)

    prep = prepare_params(params, BATCH)          # one-time weight re-layout
    fwd = jax.jit(dqn_forward)

    q_pallas = jax.block_until_ready(fwd(x, prep))
    q_ref = jax.block_until_ready(ref_forward(x, params))

    assert q_pallas.shape == (BATCH, NUM_ACTIONS)
    assert jnp.allclose(q_pallas, q_ref, atol=1e-4, rtol=1e-4), (
        "mismatch vs reference:\n%s\n%s" % (q_pallas, q_ref))
    print("KERNEL_OK")
</pallas_src>

<mosaic_0001>
module attributes {stable_mosaic.version = 11 : i64} {
  func.func @dqn_fused_kernel(%arg0: memref<4x128xf32, #tpu.memory_space<vmem>>, %arg1: memref<9x128x128xf32, #tpu.memory_space<vmem>>, %arg2: memref<144x4xf32, #tpu.memory_space<vmem>>, %arg3: memref<16x1xf32, #tpu.memory_space<vmem>>, %arg4: memref<72x16xf32, #tpu.memory_space<vmem>>, %arg5: memref<8x1xf32, #tpu.memory_space<vmem>>, %arg6: memref<8x64x256xf32, #tpu.memory_space<vmem>>, %arg7: memref<1x256xf32, #tpu.memory_space<vmem>>, %arg8: memref<256x6xf32, #tpu.memory_space<vmem>>, %arg9: memref<1x6xf32, #tpu.memory_space<vmem>>, %arg10: memref<2x6xf32, #tpu.memory_space<vmem>>) attributes {dimension_semantics = [], scalar_prefetch = 0 : i64, scratch_operands = 0 : i64, tpu.core_type = #tpu.core_type<tc>} {
    %c0 = arith.constant 0 : index
    %c0_0 = arith.constant 0 : index
    %0 = vector.load %arg0[%c0, %c0_0] : memref<4x128xf32, #tpu.memory_space<vmem>>, vector<4x128xf32>
    %c0_1 = arith.constant 0 : index
    %c0_2 = arith.constant 0 : index
    %1 = vector.load %arg2[%c0_1, %c0_2] : memref<144x4xf32, #tpu.memory_space<vmem>>, vector<144x4xf32>
    %cst = arith.constant dense<0.000000e+00> : vector<144x128xf32>
    %2 = tpu.matmul %1, %0, %cst {dimension_numbers = #tpu.dot_dimension_numbers<[1], [0], [0], [1], [0, 0, 1, 1], [], []>} : vector<144x4xf32>, vector<4x128xf32>, vector<144x128xf32> -> vector<144x128xf32>
    %cst_3 = arith.constant 0.000000e+00 : f32
    %3 = vector.broadcast %cst_3 : f32 to vector<16x128xf32>
    %4 = vector.extract_strided_slice %2 {offsets = [0, 0], sizes = [16, 128], strides = [1, 1]} : vector<144x128xf32> to vector<16x128xf32>
    %c0_4 = arith.constant 0 : index
    %c0_5 = arith.constant 0 : index
    %c0_6 = arith.constant 0 : index
    %5 = vector.load %arg1[%c0_4, %c0_5, %c0_6] : memref<9x128x128xf32, #tpu.memory_space<vmem>>, vector<1x128x128xf32>
    %6 = vector.shape_cast %5 : vector<1x128x128xf32> to vector<128x128xf32>
    %cst_7 = arith.constant dense<0.000000e+00> : vector<16x128xf32>
    %7 = tpu.matmul %4, %6, %cst_7 {dimension_numbers = #tpu.dot_dimension_numbers<[1], [0], [0], [1], [0, 0, 1, 1], [], []>} : vector<16x128xf32>, vector<128x128xf32>, vector<16x128xf32> -> vector<16x128xf32>
    %8 = arith.addf %3, %7 : vector<16x128xf32>
    %9 = vector.extract_strided_slice %2 {offsets = [16, 0], sizes = [16, 128], strides = [1, 1]} : vector<144x128xf32> to vector<16x128xf32>
    %c1 = arith.constant 1 : index
    %c0_8 = arith.constant 0 : index
    %c0_9 = arith.constant 0 : index
    %10 = vector.load %arg1[%c1, %c0_8, %c0_9] : memref<9x128x128xf32, #tpu.memory_space<vmem>>, vector<1x128x128xf32>
    %11 = vector.shape_cast %10 : vector<1x128x128xf32> to vector<128x128xf32>
    %cst_10 = arith.constant dense<0.000000e+00> : vector<16x128xf32>
    %12 = tpu.matmul %9, %11, %cst_10 {dimension_numbers = #tpu.dot_dimension_numbers<[1], [0], [0], [1], [0, 0, 1, 1], [], []>} : vector<16x128xf32>, vector<128x128xf32>, vector<16x128xf32> -> vector<16x128xf32>
    %13 = arith.addf %8, %12 : vector<16x128xf32>
    %14 = vector.extract_strided_slice %2 {offsets = [32, 0], sizes = [16, 128], strides = [1, 1]} : vector<144x128xf32> to vector<16x128xf32>
    %c2 = arith.constant 2 : index
    %c0_11 = arith.constant 0 : index
    %c0_12 = arith.constant 0 : index
    %15 = vector.load %arg1[%c2, %c0_11, %c0_12] : memref<9x128x128xf32, #tpu.memory_space<vmem>>, vector<1x128x128xf32>
    %16 = vector.shape_cast %15 : vector<1x128x128xf32> to vector<128x128xf32>
    %cst_13 = arith.constant dense<0.000000e+00> : vector<16x128xf32>
    %17 = tpu.matmul %14, %16, %cst_13 {dimension_numbers = #tpu.dot_dimension_numbers<[1], [0], [0], [1], [0, 0, 1, 1], [], []>} : vector<16x128xf32>, vector<128x128xf32>, vector<16x128xf32> -> vector<16x128xf32>
    %18 = arith.addf %13, %17 : vector<16x128xf32>
    %19 = vector.extract_strided_slice %2 {offsets = [48, 0], sizes = [16, 128], strides = [1, 1]} : vector<144x128xf32> to vector<16x128xf32>
    %c3 = arith.constant 3 : index
    %c0_14 = arith.constant 0 : index
    %c0_15 = arith.constant 0 : index
    %20 = vector.load %arg1[%c3, %c0_14, %c0_15] : memref<9x128x128xf32, #tpu.memory_space<vmem>>, vector<1x128x128xf32>
    %21 = vector.shape_cast %20 : vector<1x128x128xf32> to vector<128x128xf32>
    %cst_16 = arith.constant dense<0.000000e+00> : vector<16x128xf32>
    %22 = tpu.matmul %19, %21, %cst_16 {dimension_numbers = #tpu.dot_dimension_numbers<[1], [0], [0], [1], [0, 0, 1, 1], [], []>} : vector<16x128xf32>, vector<128x128xf32>, vector<16x128xf32> -> vector<16x128xf32>
    %23 = arith.addf %18, %22 : vector<16x128xf32>
    %24 = vector.extract_strided_slice %2 {offsets = [64, 0], sizes = [16, 128], strides = [1, 1]} : vector<144x128xf32> to vector<16x128xf32>
    %c4 = arith.constant 4 : index
    %c0_17 = arith.constant 0 : index
    %c0_18 = arith.constant 0 : index
    %25 = vector.load %arg1[%c4, %c0_17, %c0_18] : memref<9x128x128xf32, #tpu.memory_space<vmem>>, vector<1x128x128xf32>
    %26 = vector.shape_cast %25 : vector<1x128x128xf32> to vector<128x128xf32>
    %cst_19 = arith.constant dense<0.000000e+00> : vector<16x128xf32>
    %27 = tpu.matmul %24, %26, %cst_19 {dimension_numbers = #tpu.dot_dimension_numbers<[1], [0], [0], [1], [0, 0, 1, 1], [], []>} : vector<16x128xf32>, vector<128x128xf32>, vector<16x128xf32> -> vector<16x128xf32>
    %28 = arith.addf %23, %27 : vector<16x128xf32>
    %29 = vector.extract_strided_slice %2 {offsets = [80, 0], sizes = [16, 128], strides = [1, 1]} : vector<144x128xf32> to vector<16x128xf32>
    %c5 = arith.constant 5 : index
    %c0_20 = arith.constant 0 : index
    %c0_21 = arith.constant 0 : index
    %30 = vector.load %arg1[%c5, %c0_20, %c0_21] : memref<9x128x128xf32, #tpu.memory_space<vmem>>, vector<1x128x128xf32>
    %31 = vector.shape_cast %30 : vector<1x128x128xf32> to vector<128x128xf32>
    %cst_22 = arith.constant dense<0.000000e+00> : vector<16x128xf32>
    %32 = tpu.matmul %29, %31, %cst_22 {dimension_numbers = #tpu.dot_dimension_numbers<[1], [0], [0], [1], [0, 0, 1, 1], [], []>} : vector<16x128xf32>, vector<128x128xf32>, vector<16x128xf32> -> vector<16x128xf32>
    %33 = arith.addf %28, %32 : vector<16x128xf32>
    %34 = vector.extract_strided_slice %2 {offsets = [96, 0], sizes = [16, 128], strides = [1, 1]} : vector<144x128xf32> to vector<16x128xf32>
    %c6 = arith.constant 6 : index
    %c0_23 = arith.constant 0 : index
    %c0_24 = arith.constant 0 : index
    %35 = vector.load %arg1[%c6, %c0_23, %c0_24] : memref<9x128x128xf32, #tpu.memory_space<vmem>>, vector<1x128x128xf32>
    %36 = vector.shape_cast %35 : vector<1x128x128xf32> to vector<128x128xf32>
    %cst_25 = arith.constant dense<0.000000e+00> : vector<16x128xf32>
    %37 = tpu.matmul %34, %36, %cst_25 {dimension_numbers = #tpu.dot_dimension_numbers<[1], [0], [0], [1], [0, 0, 1, 1], [], []>} : vector<16x128xf32>, vector<128x128xf32>, vector<16x128xf32> -> vector<16x128xf32>
    %38 = arith.addf %33, %37 : vector<16x128xf32>
    %39 = vector.extract_strided_slice %2 {offsets = [112, 0], sizes = [16, 128], strides = [1, 1]} : vector<144x128xf32> to vector<16x128xf32>
    %c7 = arith.constant 7 : index
    %c0_26 = arith.constant 0 : index
    %c0_27 = arith.constant 0 : index
    %40 = vector.load %arg1[%c7, %c0_26, %c0_27] : memref<9x128x128xf32, #tpu.memory_space<vmem>>, vector<1x128x128xf32>
    %41 = vector.shape_cast %40 : vector<1x128x128xf32> to vector<128x128xf32>
    %cst_28 = arith.constant dense<0.000000e+00> : vector<16x128xf32>
    %42 = tpu.matmul %39, %41, %cst_28 {dimension_numbers = #tpu.dot_dimension_numbers<[1], [0], [0], [1], [0, 0, 1, 1], [], []>} : vector<16x128xf32>, vector<128x128xf32>, vector<16x128xf32> -> vector<16x128xf32>
    %43 = arith.addf %38, %42 : vector<16x128xf32>
    %44 = vector.extract_strided_slice %2 {offsets = [128, 0], sizes = [16, 128], strides = [1, 1]} : vector<144x128xf32> to vector<16x128xf32>
    %c8 = arith.constant 8 : index
    %c0_29 = arith.constant 0 : index
    %c0_30 = arith.constant 0 : index
    %45 = vector.load %arg1[%c8, %c0_29, %c0_30] : memref<9x128x128xf32, #tpu.memory_space<vmem>>, vector<1x128x128xf32>
    %46 = vector.shape_cast %45 : vector<1x128x128xf32> to vector<128x128xf32>
    %cst_31 = arith.constant dense<0.000000e+00> : vector<16x128xf32>
    %47 = tpu.matmul %44, %46, %cst_31 {dimension_numbers = #tpu.dot_dimension_numbers<[1], [0], [0], [1], [0, 0, 1, 1], [], []>} : vector<16x128xf32>, vector<128x128xf32>, vector<16x128xf32> -> vector<16x128xf32>
    %48 = arith.addf %43, %47 : vector<16x128xf32>
    %c0_32 = arith.constant 0 : index
    %c0_33 = arith.constant 0 : index
    %49 = vector.load %arg3[%c0_32, %c0_33] : memref<16x1xf32, #tpu.memory_space<vmem>>, vector<16x1xf32>
    %50 = vector.broadcast %49 : vector<16x1xf32> to vector<16x128xf32>
    %51 = arith.addf %48, %50 : vector<16x128xf32>
    %cst_34 = arith.constant 0.000000e+00 : f32
    %52 = vector.broadcast %cst_34 : f32 to vector<16x128xf32>
    %53 = arith.maximumf %51, %52 : vector<16x128xf32>
    %c0_35 = arith.constant 0 : index
    %c0_36 = arith.constant 0 : index
    %54 = vector.load %arg4[%c0_35, %c0_36] : memref<72x16xf32, #tpu.memory_space<vmem>>, vector<72x16xf32>
    %cst_37 = arith.constant dense<0.000000e+00> : vector<72x128xf32>
    %55 = tpu.matmul %54, %53, %cst_37 {dimension_numbers = #tpu.dot_dimension_numbers<[1], [0], [0], [1], [0, 0, 1, 1], [], []>} : vector<72x16xf32>, vector<16x128xf32>, vector<72x128xf32> -> vector<72x128xf32>
    %cst_38 = arith.constant 0.000000e+00 : f32
    %56 = vector.broadcast %cst_38 : f32 to vector<8x128xf32>
    %57 = vector.extract_strided_slice %55 {offsets = [0, 0], sizes = [8, 128], strides = [1, 1]} : vector<72x128xf32> to vector<8x128xf32>
    %c0_39 = arith.constant 0 : index
    %c0_40 = arith.constant 0 : index
    %c0_41 = arith.constant 0 : index
    %58 = vector.load %arg1[%c0_39, %c0_40, %c0_41] : memref<9x128x128xf32, #tpu.memory_space<vmem>>, vector<1x128x128xf32>
    %59 = vector.shape_cast %58 : vector<1x128x128xf32> to vector<128x128xf32>
    %cst_42 = arith.constant dense<0.000000e+00> : vector<8x128xf32>
    %60 = tpu.matmul %57, %59, %cst_42 {dimension_numbers = #tpu.dot_dimension_numbers<[1], [0], [0], [1], [0, 0, 1, 1], [], []>} : vector<8x128xf32>, vector<128x128xf32>, vector<8x128xf32> -> vector<8x128xf32>
    %61 = arith.addf %56, %60 : vector<8x128xf32>
    %62 = vector.extract_strided_slice %55 {offsets = [8, 0], sizes = [8, 128], strides = [1, 1]} : vector<72x128xf32> to vector<8x128xf32>
    %c1_43 = arith.constant 1 : index
    %c0_44 = arith.constant 0 : index
    %c0_45 = arith.constant 0 : index
    %63 = vector.load %arg1[%c1_43, %c0_44, %c0_45] : memref<9x128x128xf32, #tpu.memory_space<vmem>>, vector<1x128x128xf32>
    %64 = vector.shape_cast %63 : vector<1x128x128xf32> to vector<128x128xf32>
    %cst_46 = arith.constant dense<0.000000e+00> : vector<8x128xf32>
    %65 = tpu.matmul %62, %64, %cst_46 {dimension_numbers = #tpu.dot_dimension_numbers<[1], [0], [0], [1], [0, 0, 1, 1], [], []>} : vector<8x128xf32>, vector<128x128xf32>, vector<8x128xf32> -> vector<8x128xf32>
    %66 = arith.addf %61, %65 : vector<8x128xf32>
    %67 = vector.extract_strided_slice %55 {offsets = [16, 0], sizes = [8, 128], strides = [1, 1]} : vector<72x128xf32> to vector<8x128xf32>
    %c2_47 = arith.constant 2 : index
    %c0_48 = arith.constant 0 : index
    %c0_49 = arith.constant 0 : index
    %68 = vector.load %arg1[%c2_47, %c0_48, %c0_49] : memref<9x128x128xf32, #tpu.memory_space<vmem>>, vector<1x128x128xf32>
    %69 = vector.shape_cast %68 : vector<1x128x128xf32> to vector<128x128xf32>
    %cst_50 = arith.constant dense<0.000000e+00> : vector<8x128xf32>
    %70 = tpu.matmul %67, %69, %cst_50 {dimension_numbers = #tpu.dot_dimension_numbers<[1], [0], [0], [1], [0, 0, 1, 1], [], []>} : vector<8x128xf32>, vector<128x128xf32>, vector<8x128xf32> -> vector<8x128xf32>
    %71 = arith.addf %66, %70 : vector<8x128xf32>
    %72 = vector.extract_strided_slice %55 {offsets = [24, 0], sizes = [8, 128], strides = [1, 1]} : vector<72x128xf32> to vector<8x128xf32>
    %c3_51 = arith.constant 3 : index
    %c0_52 = arith.constant 0 : index
    %c0_53 = arith.constant 0 : index
    %73 = vector.load %arg1[%c3_51, %c0_52, %c0_53] : memref<9x128x128xf32, #tpu.memory_space<vmem>>, vector<1x128x128xf32>
    %74 = vector.shape_cast %73 : vector<1x128x128xf32> to vector<128x128xf32>
    %cst_54 = arith.constant dense<0.000000e+00> : vector<8x128xf32>
    %75 = tpu.matmul %72, %74, %cst_54 {dimension_numbers = #tpu.dot_dimension_numbers<[1], [0], [0], [1], [0, 0, 1, 1], [], []>} : vector<8x128xf32>, vector<128x128xf32>, vector<8x128xf32> -> vector<8x128xf32>
    %76 = arith.addf %71, %75 : vector<8x128xf32>
    %77 = vector.extract_strided_slice %55 {offsets = [32, 0], sizes = [8, 128], strides = [1, 1]} : vector<72x128xf32> to vector<8x128xf32>
    %c4_55 = arith.constant 4 : index
    %c0_56 = arith.constant 0 : index
    %c0_57 = arith.constant 0 : index
    %78 = vector.load %arg1[%c4_55, %c0_56, %c0_57] : memref<9x128x128xf32, #tpu.memory_space<vmem>>, vector<1x128x128xf32>
    %79 = vector.shape_cast %78 : vector<1x128x128xf32> to vector<128x128xf32>
    %cst_58 = arith.constant dense<0.000000e+00> : vector<8x128xf32>
    %80 = tpu.matmul %77, %79, %cst_58 {dimension_numbers = #tpu.dot_dimension_numbers<[1], [0], [0], [1], [0, 0, 1, 1], [], []>} : vector<8x128xf32>, vector<128x128xf32>, vector<8x128xf32> -> vector<8x128xf32>
    %81 = arith.addf %76, %80 : vector<8x128xf32>
    %82 = vector.extract_strided_slice %55 {offsets = [40, 0], sizes = [8, 128], strides = [1, 1]} : vector<72x128xf32> to vector<8x128xf32>
    %c5_59 = arith.constant 5 : index
    %c0_60 = arith.constant 0 : index
    %c0_61 = arith.constant 0 : index
    %83 = vector.load %arg1[%c5_59, %c0_60, %c0_61] : memref<9x128x128xf32, #tpu.memory_space<vmem>>, vector<1x128x128xf32>
    %84 = vector.shape_cast %83 : vector<1x128x128xf32> to vector<128x128xf32>
    %cst_62 = arith.constant dense<0.000000e+00> : vector<8x128xf32>
    %85 = tpu.matmul %82, %84, %cst_62 {dimension_numbers = #tpu.dot_dimension_numbers<[1], [0], [0], [1], [0, 0, 1, 1], [], []>} : vector<8x128xf32>, vector<128x128xf32>, vector<8x128xf32> -> vector<8x128xf32>
    %86 = arith.addf %81, %85 : vector<8x128xf32>
    %87 = vector.extract_strided_slice %55 {offsets = [48, 0], sizes = [8, 128], strides = [1, 1]} : vector<72x128xf32> to vector<8x128xf32>
    %c6_63 = arith.constant 6 : index
    %c0_64 = arith.constant 0 : index
    %c0_65 = arith.constant 0 : index
    %88 = vector.load %arg1[%c6_63, %c0_64, %c0_65] : memref<9x128x128xf32, #tpu.memory_space<vmem>>, vector<1x128x128xf32>
    %89 = vector.shape_cast %88 : vector<1x128x128xf32> to vector<128x128xf32>
    %cst_66 = arith.constant dense<0.000000e+00> : vector<8x128xf32>
    %90 = tpu.matmul %87, %89, %cst_66 {dimension_numbers = #tpu.dot_dimension_numbers<[1], [0], [0], [1], [0, 0, 1, 1], [], []>} : vector<8x128xf32>, vector<128x128xf32>, vector<8x128xf32> -> vector<8x128xf32>
    %91 = arith.addf %86, %90 : vector<8x128xf32>
    %92 = vector.extract_strided_slice %55 {offsets = [56, 0], sizes = [8, 128], strides = [1, 1]} : vector<72x128xf32> to vector<8x128xf32>
    %c7_67 = arith.constant 7 : index
    %c0_68 = arith.constant 0 : index
    %c0_69 = arith.constant 0 : index
    %93 = vector.load %arg1[%c7_67, %c0_68, %c0_69] : memref<9x128x128xf32, #tpu.memory_space<vmem>>, vector<1x128x128xf32>
    %94 = vector.shape_cast %93 : vector<1x128x128xf32> to vector<128x128xf32>
    %cst_70 = arith.constant dense<0.000000e+00> : vector<8x128xf32>
    %95 = tpu.matmul %92, %94, %cst_70 {dimension_numbers = #tpu.dot_dimension_numbers<[1], [0], [0], [1], [0, 0, 1, 1], [], []>} : vector<8x128xf32>, vector<128x128xf32>, vector<8x128xf32> -> vector<8x128xf32>
    %96 = arith.addf %91, %95 : vector<8x128xf32>
    %97 = vector.extract_strided_slice %55 {offsets = [64, 0], sizes = [8, 128], strides = [1, 1]} : vector<72x128xf32> to vector<8x128xf32>
    %c8_71 = arith.constant 8 : index
    %c0_72 = arith.constant 0 : index
    %c0_73 = arith.constant 0 : index
    %98 = vector.load %arg1[%c8_71, %c0_72, %c0_73] : memref<9x128x128xf32, #tpu.memory_space<vmem>>, vector<1x128x128xf32>
    %99 = vector.shape_cast %98 : vector<1x128x128xf32> to vector<128x128xf32>
    %cst_74 = arith.constant dense<0.000000e+00> : vector<8x128xf32>
    %100 = tpu.matmul %97, %99, %cst_74 {dimension_numbers = #tpu.dot_dimension_numbers<[1], [0], [0], [1], [0, 0, 1, 1], [], []>} : vector<8x128xf32>, vector<128x128xf32>, vector<8x128xf32> -> vector<8x128xf32>
    %101 = arith.addf %96, %100 : vector<8x128xf32>
    %c0_75 = arith.constant 0 : index
    %c0_76 = arith.constant 0 : index
    %102 = vector.load %arg5[%c0_75, %c0_76] : memref<8x1xf32, #tpu.memory_space<vmem>>, vector<8x1xf32>
    %103 = vector.broadcast %102 : vector<8x1xf32> to vector<8x128xf32>
    %104 = arith.addf %101, %103 : vector<8x128xf32>
    %cst_77 = arith.constant 0.000000e+00 : f32
    %105 = vector.broadcast %cst_77 : f32 to vector<8x128xf32>
    %106 = arith.maximumf %104, %105 : vector<8x128xf32>
    %c0_78 = arith.constant 0 : index
    %c0_79 = arith.constant 0 : index
    %107 = vector.load %arg7[%c0_78, %c0_79] : memref<1x256xf32, #tpu.memory_space<vmem>>, vector<1x256xf32>
    %c0_80 = arith.constant 0 : index
    %c0_81 = arith.constant 0 : index
    %108 = vector.load %arg7[%c0_80, %c0_81] : memref<1x256xf32, #tpu.memory_space<vmem>>, vector<1x256xf32>
    %c0_82 = arith.constant 0 : index
    %c0_83 = arith.constant 0 : index
    %c0_84 = arith.constant 0 : index
    %109 = vector.load %arg6[%c0_82, %c0_83, %c0_84] : memref<8x64x256xf32, #tpu.memory_space<vmem>>, vector<1x64x256xf32>
    %110 = vector.shape_cast %109 : vector<1x64x256xf32> to vector<64x256xf32>
    %111 = vector.extract_strided_slice %106 {offsets = [0, 0], sizes = [1, 64], strides = [1, 1]} : vector<8x128xf32> to vector<1x64xf32>
    %cst_85 = arith.constant dense<0.000000e+00> : vector<1x256xf32>
    %112 = tpu.matmul %111, %110, %cst_85 {dimension_numbers = #tpu.dot_dimension_numbers<[1], [0], [0], [1], [0, 0, 1, 1], [], []>} : vector<1x64xf32>, vector<64x256xf32>, vector<1x256xf32> -> vector<1x256xf32>
    %113 = arith.addf %107, %112 : vector<1x256xf32>
    %114 = vector.extract_strided_slice %106 {offsets = [0, 64], sizes = [1, 64], strides = [1, 1]} : vector<8x128xf32> to vector<1x64xf32>
    %cst_86 = arith.constant dense<0.000000e+00> : vector<1x256xf32>
    %115 = tpu.matmul %114, %110, %cst_86 {dimension_numbers = #tpu.dot_dimension_numbers<[1], [0], [0], [1], [0, 0, 1, 1], [], []>} : vector<1x64xf32>, vector<64x256xf32>, vector<1x256xf32> -> vector<1x256xf32>
    %116 = arith.addf %108, %115 : vector<1x256xf32>
    %c1_87 = arith.constant 1 : index
    %c0_88 = arith.constant 0 : index
    %c0_89 = arith.constant 0 : index
    %117 = vector.load %arg6[%c1_87, %c0_88, %c0_89] : memref<8x64x256xf32, #tpu.memory_space<vmem>>, vector<1x64x256xf32>
    %118 = vector.shape_cast %117 : vector<1x64x256xf32> to vector<64x256xf32>
    %119 = vector.extract_strided_slice %106 {offsets = [1, 0], sizes = [1, 64], strides = [1, 1]} : vector<8x128xf32> to vector<1x64xf32>
    %cst_90 = arith.constant dense<0.000000e+00> : vector<1x256xf32>
    %120 = tpu.matmul %119, %118, %cst_90 {dimension_numbers = #tpu.dot_dimension_numbers<[1], [0], [0], [1], [0, 0, 1, 1], [], []>} : vector<1x64xf32>, vector<64x256xf32>, vector<1x256xf32> -> vector<1x256xf32>
    %121 = arith.addf %113, %120 : vector<1x256xf32>
    %122 = vector.extract_strided_slice %106 {offsets = [1, 64], sizes = [1, 64], strides = [1, 1]} : vector<8x128xf32> to vector<1x64xf32>
    %cst_91 = arith.constant dense<0.000000e+00> : vector<1x256xf32>
    %123 = tpu.matmul %122, %118, %cst_91 {dimension_numbers = #tpu.dot_dimension_numbers<[1], [0], [0], [1], [0, 0, 1, 1], [], []>} : vector<1x64xf32>, vector<64x256xf32>, vector<1x256xf32> -> vector<1x256xf32>
    %124 = arith.addf %116, %123 : vector<1x256xf32>
    %c2_92 = arith.constant 2 : index
    %c0_93 = arith.constant 0 : index
    %c0_94 = arith.constant 0 : index
    %125 = vector.load %arg6[%c2_92, %c0_93, %c0_94] : memref<8x64x256xf32, #tpu.memory_space<vmem>>, vector<1x64x256xf32>
    %126 = vector.shape_cast %125 : vector<1x64x256xf32> to vector<64x256xf32>
    %127 = vector.extract_strided_slice %106 {offsets = [2, 0], sizes = [1, 64], strides = [1, 1]} : vector<8x128xf32> to vector<1x64xf32>
    %cst_95 = arith.constant dense<0.000000e+00> : vector<1x256xf32>
    %128 = tpu.matmul %127, %126, %cst_95 {dimension_numbers = #tpu.dot_dimension_numbers<[1], [0], [0], [1], [0, 0, 1, 1], [], []>} : vector<1x64xf32>, vector<64x256xf32>, vector<1x256xf32> -> vector<1x256xf32>
    %129 = arith.addf %121, %128 : vector<1x256xf32>
    %130 = vector.extract_strided_slice %106 {offsets = [2, 64], sizes = [1, 64], strides = [1, 1]} : vector<8x128xf32> to vector<1x64xf32>
    %cst_96 = arith.constant dense<0.000000e+00> : vector<1x256xf32>
    %131 = tpu.matmul %130, %126, %cst_96 {dimension_numbers = #tpu.dot_dimension_numbers<[1], [0], [0], [1], [0, 0, 1, 1], [], []>} : vector<1x64xf32>, vector<64x256xf32>, vector<1x256xf32> -> vector<1x256xf32>
    %132 = arith.addf %124, %131 : vector<1x256xf32>
    %c3_97 = arith.constant 3 : index
    %c0_98 = arith.constant 0 : index
    %c0_99 = arith.constant 0 : index
    %133 = vector.load %arg6[%c3_97, %c0_98, %c0_99] : memref<8x64x256xf32, #tpu.memory_space<vmem>>, vector<1x64x256xf32>
    %134 = vector.shape_cast %133 : vector<1x64x256xf32> to vector<64x256xf32>
    %135 = vector.extract_strided_slice %106 {offsets = [3, 0], sizes = [1, 64], strides = [1, 1]} : vector<8x128xf32> to vector<1x64xf32>
    %cst_100 = arith.constant dense<0.000000e+00> : vector<1x256xf32>
    %136 = tpu.matmul %135, %134, %cst_100 {dimension_numbers = #tpu.dot_dimension_numbers<[1], [0], [0], [1], [0, 0, 1, 1], [], []>} : vector<1x64xf32>, vector<64x256xf32>, vector<1x256xf32> -> vector<1x256xf32>
    %137 = arith.addf %129, %136 : vector<1x256xf32>
    %138 = vector.extract_strided_slice %106 {offsets = [3, 64], sizes = [1, 64], strides = [1, 1]} : vector<8x128xf32> to vector<1x64xf32>
    %cst_101 = arith.constant dense<0.000000e+00> : vector<1x256xf32>
    %139 = tpu.matmul %138, %134, %cst_101 {dimension_numbers = #tpu.dot_dimension_numbers<[1], [0], [0], [1], [0, 0, 1, 1], [], []>} : vector<1x64xf32>, vector<64x256xf32>, vector<1x256xf32> -> vector<1x256xf32>
    %140 = arith.addf %132, %139 : vector<1x256xf32>
    %c4_102 = arith.constant 4 : index
    %c0_103 = arith.constant 0 : index
    %c0_104 = arith.constant 0 : index
    %141 = vector.load %arg6[%c4_102, %c0_103, %c0_104] : memref<8x64x256xf32, #tpu.memory_space<vmem>>, vector<1x64x256xf32>
    %142 = vector.shape_cast %141 : vector<1x64x256xf32> to vector<64x256xf32>
    %143 = vector.extract_strided_slice %106 {offsets = [4, 0], sizes = [1, 64], strides = [1, 1]} : vector<8x128xf32> to vector<1x64xf32>
    %cst_105 = arith.constant dense<0.000000e+00> : vector<1x256xf32>
    %144 = tpu.matmul %143, %142, %cst_105 {dimension_numbers = #tpu.dot_dimension_numbers<[1], [0], [0], [1], [0, 0, 1, 1], [], []>} : vector<1x64xf32>, vector<64x256xf32>, vector<1x256xf32> -> vector<1x256xf32>
    %145 = arith.addf %137, %144 : vector<1x256xf32>
    %146 = vector.extract_strided_slice %106 {offsets = [4, 64], sizes = [1, 64], strides = [1, 1]} : vector<8x128xf32> to vector<1x64xf32>
    %cst_106 = arith.constant dense<0.000000e+00> : vector<1x256xf32>
    %147 = tpu.matmul %146, %142, %cst_106 {dimension_numbers = #tpu.dot_dimension_numbers<[1], [0], [0], [1], [0, 0, 1, 1], [], []>} : vector<1x64xf32>, vector<64x256xf32>, vector<1x256xf32> -> vector<1x256xf32>
    %148 = arith.addf %140, %147 : vector<1x256xf32>
    %c5_107 = arith.constant 5 : index
    %c0_108 = arith.constant 0 : index
    %c0_109 = arith.constant 0 : index
    %149 = vector.load %arg6[%c5_107, %c0_108, %c0_109] : memref<8x64x256xf32, #tpu.memory_space<vmem>>, vector<1x64x256xf32>
    %150 = vector.shape_cast %149 : vector<1x64x256xf32> to vector<64x256xf32>
    %151 = vector.extract_strided_slice %106 {offsets = [5, 0], sizes = [1, 64], strides = [1, 1]} : vector<8x128xf32> to vector<1x64xf32>
    %cst_110 = arith.constant dense<0.000000e+00> : vector<1x256xf32>
    %152 = tpu.matmul %151, %150, %cst_110 {dimension_numbers = #tpu.dot_dimension_numbers<[1], [0], [0], [1], [0, 0, 1, 1], [], []>} : vector<1x64xf32>, vector<64x256xf32>, vector<1x256xf32> -> vector<1x256xf32>
    %153 = arith.addf %145, %152 : vector<1x256xf32>
    %154 = vector.extract_strided_slice %106 {offsets = [5, 64], sizes = [1, 64], strides = [1, 1]} : vector<8x128xf32> to vector<1x64xf32>
    %cst_111 = arith.constant dense<0.000000e+00> : vector<1x256xf32>
    %155 = tpu.matmul %154, %150, %cst_111 {dimension_numbers = #tpu.dot_dimension_numbers<[1], [0], [0], [1], [0, 0, 1, 1], [], []>} : vector<1x64xf32>, vector<64x256xf32>, vector<1x256xf32> -> vector<1x256xf32>
    %156 = arith.addf %148, %155 : vector<1x256xf32>
    %c6_112 = arith.constant 6 : index
    %c0_113 = arith.constant 0 : index
    %c0_114 = arith.constant 0 : index
    %157 = vector.load %arg6[%c6_112, %c0_113, %c0_114] : memref<8x64x256xf32, #tpu.memory_space<vmem>>, vector<1x64x256xf32>
    %158 = vector.shape_cast %157 : vector<1x64x256xf32> to vector<64x256xf32>
    %159 = vector.extract_strided_slice %106 {offsets = [6, 0], sizes = [1, 64], strides = [1, 1]} : vector<8x128xf32> to vector<1x64xf32>
    %cst_115 = arith.constant dense<0.000000e+00> : vector<1x256xf32>
    %160 = tpu.matmul %159, %158, %cst_115 {dimension_numbers = #tpu.dot_dimension_numbers<[1], [0], [0], [1], [0, 0, 1, 1], [], []>} : vector<1x64xf32>, vector<64x256xf32>, vector<1x256xf32> -> vector<1x256xf32>
    %161 = arith.addf %153, %160 : vector<1x256xf32>
    %162 = vector.extract_strided_slice %106 {offsets = [6, 64], sizes = [1, 64], strides = [1, 1]} : vector<8x128xf32> to vector<1x64xf32>
    %cst_116 = arith.constant dense<0.000000e+00> : vector<1x256xf32>
    %163 = tpu.matmul %162, %158, %cst_116 {dimension_numbers = #tpu.dot_dimension_numbers<[1], [0], [0], [1], [0, 0, 1, 1], [], []>} : vector<1x64xf32>, vector<64x256xf32>, vector<1x256xf32> -> vector<1x256xf32>
    %164 = arith.addf %156, %163 : vector<1x256xf32>
    %c7_117 = arith.constant 7 : index
    %c0_118 = arith.constant 0 : index
    %c0_119 = arith.constant 0 : index
    %165 = vector.load %arg6[%c7_117, %c0_118, %c0_119] : memref<8x64x256xf32, #tpu.memory_space<vmem>>, vector<1x64x256xf32>
    %166 = vector.shape_cast %165 : vector<1x64x256xf32> to vector<64x256xf32>
    %167 = vector.extract_strided_slice %106 {offsets = [7, 0], sizes = [1, 64], strides = [1, 1]} : vector<8x128xf32> to vector<1x64xf32>
    %cst_120 = arith.constant dense<0.000000e+00> : vector<1x256xf32>
    %168 = tpu.matmul %167, %166, %cst_120 {dimension_numbers = #tpu.dot_dimension_numbers<[1], [0], [0], [1], [0, 0, 1, 1], [], []>} : vector<1x64xf32>, vector<64x256xf32>, vector<1x256xf32> -> vector<1x256xf32>
    %169 = arith.addf %161, %168 : vector<1x256xf32>
    %170 = vector.extract_strided_slice %106 {offsets = [7, 64], sizes = [1, 64], strides = [1, 1]} : vector<8x128xf32> to vector<1x64xf32>
    %cst_121 = arith.constant dense<0.000000e+00> : vector<1x256xf32>
    %171 = tpu.matmul %170, %166, %cst_121 {dimension_numbers = #tpu.dot_dimension_numbers<[1], [0], [0], [1], [0, 0, 1, 1], [], []>} : vector<1x64xf32>, vector<64x256xf32>, vector<1x256xf32> -> vector<1x256xf32>
    %172 = arith.addf %164, %171 : vector<1x256xf32>
    %cst_122 = arith.constant 0.000000e+00 : f32
    %173 = vector.broadcast %cst_122 : f32 to vector<1x256xf32>
    %174 = arith.maximumf %169, %173 : vector<1x256xf32>
    %c0_123 = arith.constant 0 : index
    %c0_124 = arith.constant 0 : index
    %175 = vector.load %arg8[%c0_123, %c0_124] : memref<256x6xf32, #tpu.memory_space<vmem>>, vector<256x6xf32>
    %cst_125 = arith.constant dense<0.000000e+00> : vector<1x6xf32>
    %176 = tpu.matmul %174, %175, %cst_125 {dimension_numbers = #tpu.dot_dimension_numbers<[1], [0], [0], [1], [0, 0, 1, 1], [], []>} : vector<1x256xf32>, vector<256x6xf32>, vector<1x6xf32> -> vector<1x6xf32>
    %c0_126 = arith.constant 0 : index
    %c0_127 = arith.constant 0 : index
    %177 = vector.load %arg9[%c0_126, %c0_127] : memref<1x6xf32, #tpu.memory_space<vmem>>, vector<1x6xf32>
    %178 = arith.addf %176, %177 : vector<1x6xf32>
    %c0_128 = arith.constant 0 : index
    %c0_129 = arith.constant 0 : index
    %179 = vector.load %arg10[%c0_128, %c0_129] : memref<2x6xf32, #tpu.memory_space<vmem>>, vector<1x6xf32>
    tpu.vector_store %arg10[%c0_128, %c0_129], %178 {strides = array<i32>} : memref<2x6xf32, #tpu.memory_space<vmem>>, vector<1x6xf32>,
    %cst_130 = arith.constant 0.000000e+00 : f32
    %180 = vector.broadcast %cst_130 : f32 to vector<1x256xf32>
    %181 = arith.maximumf %172, %180 : vector<1x256xf32>
    %c0_131 = arith.constant 0 : index
    %c0_132 = arith.constant 0 : index
    %182 = vector.load %arg8[%c0_131, %c0_132] : memref<256x6xf32, #tpu.memory_space<vmem>>, vector<256x6xf32>
    %cst_133 = arith.constant dense<0.000000e+00> : vector<1x6xf32>
    %183 = tpu.matmul %181, %182, %cst_133 {dimension_numbers = #tpu.dot_dimension_numbers<[1], [0], [0], [1], [0, 0, 1, 1], [], []>} : vector<1x256xf32>, vector<256x6xf32>, vector<1x6xf32> -> vector<1x6xf32>
    %c0_134 = arith.constant 0 : index
    %c0_135 = arith.constant 0 : index
    %184 = vector.load %arg9[%c0_134, %c0_135] : memref<1x6xf32, #tpu.memory_space<vmem>>, vector<1x6xf32>
    %185 = arith.addf %183, %184 : vector<1x6xf32>
    %c1_136 = arith.constant 1 : index
    %c0_137 = arith.constant 0 : index
    %186 = vector.load %arg10[%c1_136, %c0_137] : memref<2x6xf32, #tpu.memory_space<vmem>>, vector<1x6xf32>
    tpu.vector_store %arg10[%c1_136, %c0_137], %185 {strides = array<i32>} : memref<2x6xf32, #tpu.memory_space<vmem>>, vector<1x6xf32>,
    return
  }
}

</mosaic_0001>

<bundles_post_ra>
// kernel: dqn_forward.1
= control target key start
LH: loop header
LB: loop body
LE: loop exit
PB: predicated region body
PF: predicated region fallthrough
CT: control target
= control target key end

     0   :  { %15 = vsyncpa [#allocation3], 0  ;;  %s3507_s0 = inlined_call_operand.vmem [shape: f32[4,128], index: 0, kind: input, shape index: {}]   ;;  %s3508_s1 = inlined_call_operand.hbm [shape: f32[9,128,128], index: 1, kind: input, shape index: {}]   ;;  %s3509_s2 = inlined_call_operand.vmem [shape: f32[144,4], index: 2, kind: input, shape index: {}]   ;;  %s3510_s3 = inlined_call_operand.vmem [shape: f32[16,1], index: 3, kind: input, shape index: {}]   ;;  %s3511_s4 = inlined_call_operand.vmem [shape: f32[72,16], index: 4, kind: input, shape index: {}]   ;;  %s3512_s5 = inlined_call_operand.vmem [shape: f32[8,1], index: 5, kind: input, shape index: {}]   ;;  %s3513_s6 = inlined_call_operand.hbm [shape: f32[8,64,256], index: 6, kind: input, shape index: {}]   ;;  %s3514_s7 = inlined_call_operand.vmem [shape: f32[1,256], index: 7, kind: input, shape index: {}]   ;;  %s3515_s8 = inlined_call_operand.vmem [shape: f32[256,6], index: 8, kind: input, shape index: {}]   ;;  %s3516_s9 = inlined_call_operand.vmem [shape: f32[1,6], index: 9, kind: input, shape index: {}]   ;;  %s3517_s10 = inlined_call_operand.hbm [shape: f32[2,6], index: 10, kind: output, shape index: {}]  }
   0x1   :  { %16 = vsyncpa [#allocation6], 0 }
   0x2   :  { %17 = vsyncpa [#allocation4], 0  ;;  %s24_s15 = sshll.u32 %s3508_s1, 4  ;;  %s2140_s16 = smov [#allocation2]   ;;  %s25_s15 = int_to_ptr.hbm [resolvable:$true] %s24_s15 }
   0x3   :  { %s26_s17 = sshll.u32 %s2140_s16, 4  ;;  %s45_s20 = sshll.u32 %s3513_s6, 4  ;;  %s27_s17 = int_to_ptr.vmem [resolvable:$true] %s26_s17  ;;  %s46_s20 = int_to_ptr.hbm [resolvable:$true] %s45_s20 }
   0x4   :  { %s2141_s21 = smov 128   ;;  %s2142_s22 = smov 8  }
   0x5   :  { %32 = dma.hbm_to_vmem [thread:$0]  %s25_s15, 18432, %s27_s17, [#allocation3], %s2141_s21, %s2141_s21, %s2142_s22  }
   0x6   :  { %s2143_s23 = smov [#allocation5]   ;;  %s2144_s25 = smov 256  }
   0x7   :  { %s47_s24 = sshll.u32 %s2143_s23, 4  ;;  %s2145_s26 = smov 16   ;;  %s48_s24 = int_to_ptr.vmem [resolvable:$true] %s47_s24 }
   0x8   :  { %53 = dma.hbm_to_vmem [thread:$0]  %s46_s20, 16384, %s48_s24, [#allocation6], %s2144_s25, %s2144_s25, %s2145_s26  }
   0x9   :  { %2134 = dma.done.wait [#allocation3], 18432  }
   0xa   :  { %2135 = vsyncadd [#allocation3], 4294948864 }
   0xb   :  { %2136 = dma.done.wait [#allocation6], 16384  }
   0xc   :  { %2137 = vsyncadd [#allocation6], 4294950912  ;;  %vm142_vm0 = vcmask 1043456   ;;  %vm87_vm1 = vcmask 31744   ;;  %v68_v0 = vld [vmem:[%s3507_s0] sm:$0xf] }
   0xd   :  { %v69_v1 = vld [vmem:[%s3509_s2] sm:$0xff]  ;;  %1991 = vmatpush.msk.msra.mxu0 %vm142_vm0, %v68_v0  ;;  %v70_v2 = vld [vmem:[%s3509_s2 + $0x8] sm:$0xff]  ;;  %v71_v3 = vld [vmem:[%s3509_s2 + $0x10] sm:$0xff]  ;;  %vm615_vm2 = vcmask 130048   ;;  %vm899_vm3 = vcmask 523264   ;;  %vm946_vm4 = vcmask 1040384  }
   0xe   :  { %1992 = vmatmul.msk.f32.vlgmr.msra.gmra.mxu0 %vm87_vm1, %v69_v1  ;;  %v72_v4 = vld [vmem:[%s3509_s2 + $0x18] sm:$0xff]  ;;  %v73_v5 = vld [vmem:[%s3509_s2 + $0x20] sm:$0xff]  ;;  %v74_v6 = vld [vmem:[%s3509_s2 + $0x28] sm:$0xff]  ;;  %vm1891_vm5 = vcmask 40960   ;;  %s2148_s6 = smov [#allocation7]   ;;  %s1980_s11 = sshll.u32 %s3517_s10, 4  ;;  %s1981_s11 = int_to_ptr.hbm [resolvable:$true] %s1980_s11 }
   0xf   :  { %v75_v7 = vld [vmem:[%s3509_s2 + $0x30] sm:$0xff]  ;;  %v76_v8 = vld [vmem:[%s3509_s2 + $0x38] sm:$0xff]  ;;  %v77_v10 = vld [vmem:[%s3509_s2 + $0x40] sm:$0xff]  ;;  %s1978_s28 = sshll.u32 %s2148_s6, 4  ;;  %s1979_s28 = int_to_ptr.vmem [resolvable:$true] %s1978_s28 }
  0x10   :  { %v2245_v9 = vld [vmem:[#allocation2 + $0x78] sm:$0xff]  ;;  %v2252_v11 = vld [vmem:[#allocation2 + $0x70] sm:$0xff]  ;;  %v2254_v12 = vld [vmem:[#allocation2 + $0x68] sm:$0xff] }
  0x11   :  { %273 = vmatpush.msra.mxu2 %v2245_v9  ;;  %v2257_v13 = vld [vmem:[#allocation2 + $0x60] sm:$0xff]  ;;  %v2260_v14 = vld [vmem:[#allocation2 + $0x58] sm:$0xff]  ;;  %v78_v15 = vld [vmem:[%s3509_s2 + $0x48] sm:$0xff] }
  0x12   :  { %v2268_v16 = vld [vmem:[#allocation2 + $0x50] sm:$0xff]  ;;  %v2270_v17 = vld [vmem:[#allocation2 + $0x48] sm:$0xff]  ;;  %v2273_v18 = vld [vmem:[#allocation2 + $0xf8] sm:$0xff] }
  0x13   :  { %274 = vmatpush.msra.mxu2 %v2252_v11  ;;  %v2275_v19 = vld [vmem:[#allocation2 + $0x40] sm:$0xff]  ;;  %250 = vmatpush.msra.mxu1 %v2273_v18  ;;  %v2279_v20 = vld [vmem:[#allocation2 + $0x38] sm:$0xff]  ;;  %v79_v21 = vld [vmem:[%s3509_s2 + $0x50] sm:$0xff] }
  0x14   :  { %v2287_v22 = vld [vmem:[#allocation2 + $0xf0] sm:$0xff]  ;;  %v2291_v24 = vld [vmem:[#allocation2 + $0xe8] sm:$0xff]  ;;  %v2297_v26 = vld [vmem:[#allocation2 + $0xe0] sm:$0xff] }
  0x15   :  { %275 = vmatpush.msra.mxu2 %v2254_v12  ;;  %v2289_v23 = vld [vmem:[#allocation2 + $0x30] sm:$0xff]  ;;  %251 = vmatpush.msra.mxu1 %v2287_v22  ;;  %v2295_v25 = vld [vmem:[#allocation2 + $0x28] sm:$0xff]  ;;  %v2299_v27 = vld [vmem:[#allocation2 + $0x20] sm:$0xff] }
  0x16   :  { %1993 = vmatmul.msk.f32.gmra.mxu0 %vm87_vm1, %v70_v2  ;;  %v2303_v28 = vld [vmem:[#allocation2 + $0xd8] sm:$0xff]  ;;  %v2315_v31 = vld [vmem:[#allocation2 + $0xd0] sm:$0xff]  ;;  %v2319_v33 = vld [vmem:[#allocation2 + $0xc8] sm:$0xff] }
  0x17   :  { %276 = vmatpush.msra.mxu2 %v2257_v13  ;;  %252 = vmatpush.msra.mxu1 %v2291_v24  ;;  %v2305_v29 = vld [vmem:[#allocation2 + $0x18] sm:$0xff]  ;;  %v2317_v32 = vld [vmem:[#allocation2 + $0x10] sm:$0xff]  ;;  %v2323_v34 = vld [vmem:[#allocation2 + $0x8] sm:$0xff] }
  0x18   :  { %v80_v30 = vld [vmem:[%s3509_s2 + $0x58] sm:$0xff]  ;;  %v2327_v35 = vld [vmem:[#allocation2 + $0xc0] sm:$0xff]  ;;  %v2340_v40 = vld [vmem:[#allocation2 + $0xb0] sm:$0xff] }
  0x19   :  { %277 = vmatpush.msra.mxu2 %v2260_v14  ;;  %253 = vmatpush.msra.mxu1 %v2297_v26  ;;  %v2329_v36 = vld [vmem:[#allocation2] sm:$0xff]  ;;  %v2336_v38 = vld [vmem:[#allocation2 + $0xb8] sm:$0xff]  ;;  %v311_v41 = vld [vmem:[#allocation2 + $0x170] sm:$0xff] }
  0x1a   :  { %v81_v37 = vld [vmem:[%s3509_s2 + $0x60] sm:$0xff]  ;;  %v312_v39 = vld [vmem:[#allocation2 + $0x178] sm:$0xff]  ;;  %v2342_v42 = vld [vmem:[#allocation2 + $0xa8] sm:$0xff] }
  0x1b   :  { %278 = vmatpush.msra.mxu2 %v2268_v16  ;;  %254 = vmatpush.msra.mxu1 %v2303_v28  ;;  %v310_v43 = vld [vmem:[#allocation2 + $0x168] sm:$0xff]  ;;  %v2346_v44 = vld [vmem:[#allocation2 + $0xa0] sm:$0xff]  ;;  %v2352_v47 = vld [vmem:[#allocation2 + $0x98] sm:$0xff] }
  0x1c   :  { %313 = vmatpush.msra.mxu3 %v312_v39  ;;  %727 = vmatpush.msrb.mxu0 %v312_v39  ;;  %v309_v45 = vld [vmem:[#allocation2 + $0x160] sm:$0xff]  ;;  %v82_v46 = vld [vmem:[%s3509_s2 + $0x68] sm:$0xff]  ;;  %v308_v48 = vld [vmem:[#allocation2 + $0x158] sm:$0xff] }
  0x1d   :  { %279 = vmatpush.msra.mxu2 %v2270_v17  ;;  %255 = vmatpush.msra.mxu1 %v2315_v31  ;;  %v2356_v49 = vld [vmem:[#allocation2 + $0x90] sm:$0xff]  ;;  %v2358_v51 = vld [vmem:[#allocation2 + $0x88] sm:$0xff]  ;;  %v2362_v53 = vld [vmem:[#allocation2 + $0x80] sm:$0xff] }
  0x1e   :  { %1994 = vmatmul.msk.f32.gmra.mxu0 %vm87_vm1, %v71_v3  ;;  %314 = vmatpush.msra.mxu3 %v311_v41  ;;  %v307_v50 = vld [vmem:[#allocation2 + $0x150] sm:$0xff]  ;;  %v306_v52 = vld [vmem:[#allocation2 + $0x148] sm:$0xff]  ;;  %v305_v54 = vld [vmem:[#allocation2 + $0x140] sm:$0xff] }
  0x1f   :  { %280 = vmatpush.msra.mxu2 %v2275_v19  ;;  %256 = vmatpush.msra.mxu1 %v2319_v33  ;;  %v83_v55 = vld [vmem:[%s3509_s2 + $0x70] sm:$0xff]  ;;  %v304_v56 = vld [vmem:[#allocation2 + $0x138] sm:$0xff]  ;;  %v302_v60 = vld [vmem:[#allocation2 + $0x128] sm:$0xff] }
  0x20   :  { %315 = vmatpush.msra.mxu3 %v310_v43  ;;  %728 = vmatpush.msrb.mxu0 %v311_v41  ;;  %v2368_v57 = vld [vmem:[#allocation2 + $0x1f8] sm:$0xff]  ;;  %v303_v58 = vld [vmem:[#allocation2 + $0x130] sm:$0xff]  ;;  %v2374_v61 = vld [vmem:[#allocation2 + $0x1e8] sm:$0xff] }
  0x21   :  { %281 = vmatpush.msra.mxu2 %v2279_v20  ;;  %257 = vmatpush.msra.mxu1 %v2327_v35  ;;  %v2371_v59 = vld [vmem:[#allocation2 + $0x1f0] sm:$0xff]  ;;  %v301_v62 = vld [vmem:[#allocation2 + $0x120] sm:$0xff]  ;;  %v84_v0 = vld [vmem:[%s3509_s2 + $0x78] sm:$0xff] }
  0x22   :  { %316 = vmatpush.msra.mxu3 %v309_v45  ;;  %729 = vmatpush.msrb.mxu0 %v310_v43  ;;  %v2378_v63 = vld [vmem:[#allocation2 + $0x1e0] sm:$0xff]  ;;  %v300_v1 = vld [vmem:[#allocation2 + $0x118] sm:$0xff]  ;;  %v299_v3 = vld [vmem:[#allocation2 + $0x110] sm:$0xff] }
  0x23   :  { %282 = vmatpush.msra.mxu2 %v2289_v23  ;;  %258 = vmatpush.msra.mxu1 %v2336_v38  ;;  %v2384_v2 = vld [vmem:[#allocation2 + $0x1d8] sm:$0xff]  ;;  %v2408_v39 = vld [vmem:[#allocation2 + $0x270] sm:$0xff]  ;;  %v2411_v41 = vld [vmem:[#allocation2 + $0x1a8] sm:$0xff] }
  0x24   :  { %317 = vmatpush.msra.mxu3 %v308_v48  ;;  %730 = vmatpush.msrb.mxu0 %v309_v45  ;;  %v2413_v43 = vld [vmem:[#allocation2 + $0x268] sm:$0xff]  ;;  %v2419_v45 = vld [vmem:[#allocation2 + $0x1a0] sm:$0xff] }
  0x25   :  { %283 = vmatpush.msra.mxu2 %v2295_v25  ;;  %259 = vmatpush.msra.mxu1 %v2340_v40 }
  0x26   :  { %1995 = vmatmul.msk.f32.gmra.mxu0 %vm87_vm1, %v72_v4  ;;  %318 = vmatpush.msra.mxu3 %v307_v50  ;;  %v2387_v4 = vld [vmem:[#allocation2 + $0x1d0] sm:$0xff] }
  0x27   :  { %284 = vmatpush.msra.mxu2 %v2299_v27  ;;  %260 = vmatpush.msra.mxu1 %v2342_v42 }
  0x28   :  { %319 = vmatpush.msra.mxu3 %v306_v52  ;;  %731 = vmatpush.msrb.mxu0 %v308_v48 }
  0x29   :  { %285 = vmatpush.msra.mxu2 %v2305_v29  ;;  %261 = vmatpush.msra.mxu1 %v2346_v44 }
  0x2a   :  { %320 = vmatpush.msra.mxu3 %v305_v54  ;;  %732 = vmatpush.msrb.mxu0 %v307_v50  ;;  %v86_v50 = vld [vmem:[%s3509_s2 + $0x88] sm:$0xff] }
  0x2b   :  { %286 = vmatpush.msra.mxu2 %v2317_v32  ;;  %262 = vmatpush.msra.mxu1 %v2352_v47 }
  0x2c   :  { %321 = vmatpush.msra.mxu3 %v304_v56  ;;  %733 = vmatpush.msrb.mxu0 %v306_v52  ;;  %v2428_v52 = vld [vmem:[#allocation2 + $0x198] sm:$0xff] }
  0x2d   :  { %287 = vmatpush.msra.mxu2 %v2323_v34  ;;  %263 = vmatpush.msra.mxu1 %v2356_v49 }
  0x2e   :  { %1996 = vmatmul.msk.f32.gmra.mxu0 %vm87_vm1, %v73_v5  ;;  %322 = vmatpush.msra.mxu3 %v303_v58  ;;  %v298_v5 = vld [vmem:[#allocation2 + $0x108] sm:$0xff] }
  0x2f   :  { %288 = vmatpush.msra.mxu2 %v2329_v36  ;;  %264 = vmatpush.msra.mxu1 %v2358_v51 }
  0x30   :  { %323 = vmatpush.msra.mxu3 %v302_v60  ;;  %734 = vmatpush.msrb.mxu0 %v305_v54  ;;  %v2430_v54 = vld [vmem:[#allocation2 + $0x258] sm:$0xff] }
  0x31   :  { %265 = vmatpush.msra.mxu1 %v2362_v53 }
  0x32   :  { %324 = vmatpush.msra.mxu3 %v301_v62  ;;  %735 = vmatpush.msrb.mxu0 %v304_v56  ;;  %v2436_v56 = vld [vmem:[#allocation2 + $0x250] sm:$0xff] }
  0x33   :  { %355 = vmatpush.msrb.mxu1 %v2368_v57 }
  0x34   :  { %325 = vmatpush.msra.mxu3 %v300_v1  ;;  %736 = vmatpush.msrb.mxu0 %v303_v58  ;;  %v2439_v58 = vld [vmem:[#allocation2 + $0x188] sm:$0xff] }
  0x35   :  { %356 = vmatpush.msrb.mxu1 %v2371_v59 }
  0x36   :  { %1997 = vmatmul.msk.f32.gmra.mxu0 %vm87_vm1, %v74_v6  ;;  %v2390_v6 = vld [vmem:[#allocation2 + $0x1c8] sm:$0xff]  ;;  %326 = vmatpush.msra.mxu3 %v299_v3 }
  0x37   :  { %357 = vmatpush.msrb.mxu1 %v2374_v61  ;;  %737 = vmatpush.msrb.mxu0 %v302_v60  ;;  %v2441_v60 = vld [vmem:[#allocation2 + $0x248] sm:$0xff] }
  0x38   :  { %327 = vmatpush.msra.mxu3 %v298_v5 }
  0x39   :  { %358 = vmatpush.msrb.mxu1 %v2378_v63  ;;  %738 = vmatpush.msrb.mxu0 %v301_v62  ;;  %v2447_v62 = vld [vmem:[#allocation2 + $0x180] sm:$0xff] }
  0x3a   :  { %3599 = vst [vmem:[#allocation11_spill] sm:$0xff] %v2447_v62 }
  0x3b   :  { %359 = vmatpush.msrb.mxu1 %v2384_v2  ;;  %739 = vmatpush.msrb.mxu0 %v300_v1 }
  0x3d   :  { %360 = vmatpush.msrb.mxu1 %v2387_v4  ;;  %740 = vmatpush.msrb.mxu0 %v299_v3  ;;  %v2453_v3 = vld [vmem:[#allocation2 + $0x238] sm:$0xff] }
  0x3e   :  { %1998 = vmatmul.msk.f32.gmra.mxu0 %vm87_vm1, %v75_v7  ;;  %v297_v7 = vld [vmem:[#allocation2 + $0x100] sm:$0xff]  ;;  %3601 = vst [vmem:[#allocation13_spill] sm:$0xff] %v2453_v3 }
  0x3f   :  { %361 = vmatpush.msrb.mxu1 %v2390_v6  ;;  %328 = vmatpush.msra.mxu3 %v297_v7 }
  0x40   :  { %741 = vmatpush.msrb.mxu0 %v298_v5  ;;  %v438_v5 = vld [vmem:[#allocation2 + $0x2f8] sm:$0xff] }
  0x41   :  { %439 = vmatpush.msrb.mxu3 %v438_v5 }
  0x42   :  { %742 = vmatpush.msrb.mxu0 %v297_v7  ;;  %v437_v7 = vld [vmem:[#allocation2 + $0x2f0] sm:$0xff] }
  0x43   :  { %440 = vmatpush.msrb.mxu3 %v437_v7 }
  0x44   :  { %790 = vmatpush.msra.mxu0 %v438_v5  ;;  %v2467_v5 = vld [vmem:[#allocation2 + $0x210] sm:$0xff] }
  0x45   :  { %3606 = vst [vmem:[#allocation18_spill] sm:$0xff] %v2467_v5 }
  0x46   :  { %1999 = vmatmul.msk.f32.gmra.mxu0 %vm87_vm1, %v76_v8  ;;  %v2394_v8 = vld [vmem:[#allocation2 + $0x1c0] sm:$0xff] }
  0x47   :  { %362 = vmatpush.msrb.mxu1 %v2394_v8  ;;  %791 = vmatpush.msra.mxu0 %v437_v7  ;;  %v433_v7 = vld [vmem:[#allocation2 + $0x2d0] sm:$0xff] }
  0x4e   :  { %2000 = vmatmul.msk.f32.gmra.mxu0 %vm87_vm1, %v77_v10 }
  0x56   :  { %2001 = vmatmul.msk.f32.gmra.mxu0 %vm87_vm1, %v78_v15  ;;  %v85_v15 = vld [vmem:[%s3509_s2 + $0x80] sm:$0xff] }
  0x5e   :  { %2002 = vmatmul.msk.f32.gmra.mxu0 %vm87_vm1, %v79_v21  ;;  %v2400_v21 = vld [vmem:[#allocation2 + $0x1b8] sm:$0xff] }
  0x5f   :  { %363 = vmatpush.msrb.mxu1 %v2400_v21 }
  0x66   :  { %2003 = vmatmul.msk.f32.gmra.mxu0 %vm87_vm1, %v80_v30  ;;  %v2402_v30 = vld [vmem:[#allocation2 + $0x278] sm:$0xff] }
  0x67   :  { %397 = vmatpush.msrb.mxu2 %v2402_v30 }
  0x69   :  { %398 = vmatpush.msrb.mxu2 %v2408_v39 }
  0x6b   :  { %399 = vmatpush.msrb.mxu2 %v2413_v43 }
  0x6e   :  { %2004 = vmatmul.msk.f32.gmra.mxu0 %vm87_vm1, %v81_v37  ;;  %v2404_v37 = vld [vmem:[#allocation2 + $0x1b0] sm:$0xff] }
  0x6f   :  { %364 = vmatpush.msrb.mxu1 %v2404_v37 }
  0x71   :  { %365 = vmatpush.msrb.mxu1 %v2411_v41 }
  0x73   :  { %366 = vmatpush.msrb.mxu1 %v2419_v45 }
  0x75   :  { %367 = vmatpush.msrb.mxu1 %v2428_v52 }
  0x76   :  { %2005 = vmatmul.msk.f32.gmra.mxu0 %vm87_vm1, %v82_v46  ;;  %v2421_v46 = vld [vmem:[#allocation2 + $0x260] sm:$0xff] }
  0x77   :  { %400 = vmatpush.msrb.mxu2 %v2421_v46 }
  0x79   :  { %401 = vmatpush.msrb.mxu2 %v2430_v54 }
  0x7b   :  { %402 = vmatpush.msrb.mxu2 %v2436_v56 }
  0x7d   :  { %403 = vmatpush.msrb.mxu2 %v2441_v60 }
  0x7e   :  { %2006 = vmatmul.msk.f32.gmra.mxu0 %vm87_vm1, %v83_v55  ;;  %v2432_v55 = vld [vmem:[#allocation2 + $0x190] sm:$0xff] }
  0x7f   :  { %368 = vmatpush.msrb.mxu1 %v2432_v55 }
  0x81   :  { %369 = vmatpush.msrb.mxu1 %v2439_v58 }
  0x83   :  { %370 = vmatpush.msrb.mxu1 %v2447_v62 }
  0x86   :  { %2007 = vmatmul.msk.f32.gmra.mxu0 %vm87_vm1, %v84_v0  ;;  %v2449_v0 = vld [vmem:[#allocation2 + $0x240] sm:$0xff] }
  0x87   :  { %3600 = vst [vmem:[#allocation12_spill] sm:$0xff] %v2449_v0  ;;  %404 = vmatpush.msrb.mxu2 %v2449_v0  ;;  %v434_v0 = vld [vmem:[#allocation2 + $0x2d8] sm:$0xff] }
  0x89   :  { %405 = vmatpush.msrb.mxu2 %v2453_v3  ;;  %v2465_v3 = vld [vmem:[#allocation2 + $0x218] sm:$0xff] }
  0x8a   :  { %3605 = vst [vmem:[#allocation17_spill] sm:$0xff] %v2465_v3 }
  0x8b   :  { %v163_v10 = vpop.f32.mrf.mxu0 }
  0x8c   :  { %289 = vmatmul.f32.vlgmr.msra.gmra.mxu2 %v163_v10  ;;  %v2455_v10 = vld [vmem:[#allocation2 + $0x230] sm:$0xff] }
  0x8d   :  { %3602 = vst [vmem:[#allocation14_spill] sm:$0xff] %v2455_v10  ;;  %406 = vmatpush.msrb.mxu2 %v2455_v10  ;;  %v432_v10 = vld [vmem:[#allocation2 + $0x2c8] sm:$0xff] }
  0x8e   :  { %2008 = vmatmul.msk.f32.gmra.mxu0 %vm87_vm1, %v85_v15  ;;  %v2458_v15 = vld [vmem:[#allocation2 + $0x228] sm:$0xff] }
  0x8f   :  { %3603 = vst [vmem:[#allocation15_spill] sm:$0xff] %v2458_v15  ;;  %407 = vmatpush.msrb.mxu2 %v2458_v15  ;;  %v2470_v15 = vld [vmem:[#allocation2 + $0x208] sm:$0xff] }
  0x90   :  { %3607 = vst [vmem:[#allocation19_spill] sm:$0xff] %v2470_v15 }
  0x93   :  { %v166_v48 = vpop.f32.mrf.mxu0 }
  0x94   :  { %292 = vmatmul.f32.gmra.mxu2 %v166_v48  ;;  %v436_v48 = vld [vmem:[#allocation2 + $0x2e8] sm:$0xff] }
  0x95   :  { %441 = vmatpush.msrb.mxu3 %v436_v48  ;;  %792 = vmatpush.msra.mxu0 %v436_v48  ;;  %v431_v48 = vld [vmem:[#allocation2 + $0x2c0] sm:$0xff] }
  0x96   :  { %2009 = vmatmul.msk.f32.gmra.mxu0 %vm87_vm1, %v86_v50  ;;  %v2462_v50 = vld [vmem:[#allocation2 + $0x220] sm:$0xff] }
  0x97   :  { %3604 = vst [vmem:[#allocation16_spill] sm:$0xff] %v2462_v50  ;;  %408 = vmatpush.msrb.mxu2 %v2462_v50  ;;  %v2477_v50 = vld [vmem:[#allocation2 + $0x378] sm:$0xff] }
  0x98   :  { %3609 = vst [vmem:[#allocation21_spill] sm:$0xff] %v2477_v50 }
  0x99   :  { %409 = vmatpush.msrb.mxu2 %v2465_v3  ;;  %v430_v3 = vld [vmem:[#allocation2 + $0x2b8] sm:$0xff] }
  0x9b   :  { %v169_v1 = vpop.f32.mrf.mxu0  ;;  %410 = vmatpush.msrb.mxu2 %v2467_v5  ;;  %v2482_v5 = vld [vmem:[#allocation2 + $0x368] sm:$0xff] }
  0x9c   :  { %266 = vmatmul.f32.vlgmr.msra.gmra.mxu1 %v169_v1  ;;  %v435_v1 = vld [vmem:[#allocation2 + $0x2e0] sm:$0xff]  ;;  %3611 = vst [vmem:[#allocation23_spill] sm:$0xff] %v2482_v5 }
  0x9d   :  { %442 = vmatpush.msrb.mxu3 %v435_v1  ;;  %793 = vmatpush.msra.mxu0 %v435_v1 }
  0x9e   :  { %411 = vmatpush.msrb.mxu2 %v2470_v15  ;;  %481 = vmatpush.msra.mxu1 %v2477_v50  ;;  %v428_v15 = vld [vmem:[#allocation2 + $0x2a8] sm:$0xff]  ;;  %v426_v50 = vld [vmem:[#allocation2 + $0x298] sm:$0xff] }
  0x9f   :  { %443 = vmatpush.msrb.mxu3 %v434_v0  ;;  %794 = vmatpush.msra.mxu0 %v434_v0  ;;  %v429_v0 = vld [vmem:[#allocation2 + $0x2b0] sm:$0xff] }
  0xa1   :  { %444 = vmatpush.msrb.mxu3 %v433_v7  ;;  %795 = vmatpush.msra.mxu0 %v433_v7  ;;  %v2480_v7 = vld [vmem:[#allocation2 + $0x370] sm:$0xff] }
  0xa2   :  { %3610 = vst [vmem:[#allocation22_spill] sm:$0xff] %v2480_v7  ;;  %482 = vmatpush.msra.mxu1 %v2480_v7  ;;  %v2494_v7 = vld [vmem:[#allocation2 + $0x348] sm:$0xff] }
  0xa3   :  { %v172_v62 = vpop.f32.mrf.mxu0  ;;  %445 = vmatpush.msrb.mxu3 %v432_v10  ;;  %796 = vmatpush.msra.mxu0 %v432_v10  ;;  %v427_v10 = vld [vmem:[#allocation2 + $0x2a0] sm:$0xff]  ;;  %3614 = vst [vmem:[#allocation26_spill] sm:$0xff] %v2494_v7 }
  0xa4   :  { %269 = vmatmul.f32.gmra.mxu1 %v172_v62  ;;  %v2474_v62 = vld [vmem:[#allocation2 + $0x200] sm:$0xff] }
  0xa5   :  { %3608 = vst [vmem:[#allocation20_spill] sm:$0xff] %v2474_v62  ;;  %412 = vmatpush.msrb.mxu2 %v2474_v62  ;;  %446 = vmatpush.msrb.mxu3 %v431_v48  ;;  %v2489_v62 = vld [vmem:[#allocation2 + $0x358] sm:$0xff] }
  0xa6   :  { %797 = vmatpush.msra.mxu0 %v431_v48  ;;  %483 = vmatpush.msra.mxu1 %v2482_v5  ;;  %3613 = vst [vmem:[#allocation25_spill] sm:$0xff] %v2489_v62  ;;  %v424_v5 = vld [vmem:[#allocation2 + $0x288] sm:$0xff] }
  0xa7   :  { %447 = vmatpush.msrb.mxu3 %v430_v3 }
  0xa8   :  { %798 = vmatpush.msra.mxu0 %v430_v3  ;;  %v425_v3 = vld [vmem:[#allocation2 + $0x290] sm:$0xff] }
  0xa9   :  { %448 = vmatpush.msrb.mxu3 %v429_v0 }
  0xaa   :  { %799 = vmatpush.msra.mxu0 %v429_v0  ;;  %v2492_v0 = vld [vmem:[#allocation2 + $0x350] sm:$0xff] }
  0xab   :  { %v175_v1 = vpop.f32.mrf.mxu0  ;;  %449 = vmatpush.msrb.mxu3 %v428_v15 }
  0xac   :  { %329 = vmatmul.f32.vlgmr.msra.gmra.mxu3 %v175_v1  ;;  %v2486_v1 = vld [vmem:[#allocation2 + $0x360] sm:$0xff]  ;;  %800 = vmatpush.msra.mxu0 %v428_v15 }
  0xad   :  { %3612 = vst [vmem:[#allocation24_spill] sm:$0xff] %v2486_v1  ;;  %450 = vmatpush.msrb.mxu3 %v427_v10  ;;  %484 = vmatpush.msra.mxu1 %v2486_v1  ;;  %v423_v15 = vld [vmem:[#allocation2 + $0x280] sm:$0xff]  ;;  %v2503_v1 = vld [vmem:[#allocation2 + $0x3f8] sm:$0xff] }
  0xae   :  { %801 = vmatpush.msra.mxu0 %v427_v10  ;;  %3617 = vst [vmem:[#allocation29_spill] sm:$0xff] %v2503_v1  ;;  %523 = vmatpush.msra.mxu2 %v2503_v1  ;;  %v2525_v1 = vld [vmem:[#allocation2 + $0x318] sm:$0xff] }
  0xaf   :  { %451 = vmatpush.msrb.mxu3 %v426_v50  ;;  %485 = vmatpush.msra.mxu1 %v2489_v62  ;;  %v2501_v62 = vld [vmem:[#allocation2 + $0x338] sm:$0xff]  ;;  %3624 = vst [vmem:[#allocation36_spill] sm:$0xff] %v2525_v1 }
  0xb0   :  { %802 = vmatpush.msra.mxu0 %v426_v50  ;;  %3616 = vst [vmem:[#allocation28_spill] sm:$0xff] %v2501_v62  ;;  %v2505_v50 = vld [vmem:[#allocation2 + $0x330] sm:$0xff] }
  0xb1   :  { %452 = vmatpush.msrb.mxu3 %v425_v3  ;;  %486 = vmatpush.msra.mxu1 %v2492_v0  ;;  %3618 = vst [vmem:[#allocation30_spill] sm:$0xff] %v2505_v50 }
  0xb2   :  { %803 = vmatpush.msra.mxu0 %v425_v3  ;;  %v2509_v3 = vld [vmem:[#allocation2 + $0x3f0] sm:$0xff] }
  0xb3   :  { %v178_v48 = vpop.f32.mrf.mxu0  ;;  %453 = vmatpush.msrb.mxu3 %v424_v5  ;;  %487 = vmatpush.msra.mxu1 %v2494_v7  ;;  %3619 = vst [vmem:[#allocation31_spill] sm:$0xff] %v2509_v3  ;;  %v2511_v7 = vld [vmem:[#allocation2 + $0x328] sm:$0xff] }
  0xb4   :  { %332 = vmatmul.f32.gmra.mxu3 %v178_v48  ;;  %v2498_v48 = vld [vmem:[#allocation2 + $0x340] sm:$0xff]  ;;  %804 = vmatpush.msra.mxu0 %v424_v5  ;;  %3620 = vst [vmem:[#allocation32_spill] sm:$0xff] %v2511_v7  ;;  %v2513_v5 = vld [vmem:[#allocation2 + $0x3e8] sm:$0xff] }
  0xb5   :  { %3615 = vst [vmem:[#allocation27_spill] sm:$0xff] %v2498_v48  ;;  %454 = vmatpush.msrb.mxu3 %v423_v15  ;;  %488 = vmatpush.msra.mxu1 %v2498_v48  ;;  %v2527_v48 = vld [vmem:[#allocation2 + $0x3d8] sm:$0xff] }
  0xb6   :  { %805 = vmatpush.msra.mxu0 %v423_v15  ;;  %3621 = vst [vmem:[#allocation33_spill] sm:$0xff] %v2513_v5  ;;  %524 = vmatpush.msra.mxu2 %v2509_v3  ;;  %v2521_v15 = vld [vmem:[#allocation2 + $0x3e0] sm:$0xff]  ;;  %v2535_v3 = vld [vmem:[#allocation2 + $0x308] sm:$0xff] }
  0xb7   :  { %489 = vmatpush.msra.mxu1 %v2501_v62  ;;  %3623 = vst [vmem:[#allocation35_spill] sm:$0xff] %v2521_v15 }
  0xb8   :  { %525 = vmatpush.msra.mxu2 %v2513_v5  ;;  %3625 = vst [vmem:[#allocation37_spill] sm:$0xff] %v2527_v48  ;;  %v2533_v5 = vld [vmem:[#allocation2 + $0x3d0] sm:$0xff] }
  0xb9   :  { %490 = vmatpush.msra.mxu1 %v2505_v50  ;;  %v2529_v50 = vld [vmem:[#allocation2 + $0x310] sm:$0xff]  ;;  %3627 = vst [vmem:[#allocation39_spill] sm:$0xff] %v2533_v5 }
  0xba   :  { %526 = vmatpush.msra.mxu2 %v2521_v15  ;;  %3626 = vst [vmem:[#allocation38_spill] sm:$0xff] %v2529_v50  ;;  %v2545_v15 = vld [vmem:[#allocation2 + $0x3c0] sm:$0xff] }
  0xbb   :  { %v181_v10 = vpop.f32.mrf.mxu0  ;;  %491 = vmatpush.msra.mxu1 %v2511_v7  ;;  %3628 = vst [vmem:[#allocation40_spill] sm:$0xff] %v2535_v3  ;;  %v2537_v7 = vld [vmem:[#allocation2 + $0x3c8] sm:$0xff] }
  0xbc   :  { %371 = vmatmul.f32.vlgmr.msrb.gmra.mxu1 %v181_v10  ;;  %v2519_v10 = vld [vmem:[#allocation2 + $0x320] sm:$0xff]  ;;  %527 = vmatpush.msra.mxu2 %v2527_v48  ;;  %3629 = vst [vmem:[#allocation41_spill] sm:$0xff] %v2537_v7  ;;  %v2549_v48 = vld [vmem:[#allocation2 + $0x3b8] sm:$0xff] }
  0xbd   :  { %3622 = vst [vmem:[#allocation34_spill] sm:$0xff] %v2519_v10  ;;  %492 = vmatpush.msra.mxu1 %v2519_v10  ;;  %v2551_v10 = vld [vmem:[#allocation2 + $0x478] sm:$0xff] }
  0xbe   :  { %528 = vmatpush.msra.mxu2 %v2533_v5  ;;  %3631 = vst [vmem:[#allocation43_spill] sm:$0xff] %v2545_v15  ;;  %565 = vmatpush.msra.mxu3 %v2551_v10  ;;  %v2559_v5 = vld [vmem:[#allocation2 + $0x3a8] sm:$0xff] }
  0xbf   :  { %493 = vmatpush.msra.mxu1 %v2525_v1  ;;  %3632 = vst [vmem:[#allocation44_spill] sm:$0xff] %v2549_v48 }
  0xc0   :  { %529 = vmatpush.msra.mxu2 %v2537_v7  ;;  %3633 = vst [vmem:[#allocation45_spill] sm:$0xff] %v2551_v10  ;;  %v2557_v7 = vld [vmem:[#allocation2 + $0x470] sm:$0xff]  ;;  %v2573_v10 = vld [vmem:[#allocation2 + $0x398] sm:$0xff] }
  0xc1   :  { %494 = vmatpush.msra.mxu1 %v2529_v50  ;;  %v2553_v50 = vld [vmem:[#allocation2 + $0x3b0] sm:$0xff]  ;;  %3635 = vst [vmem:[#allocation47_spill] sm:$0xff] %v2557_v7  ;;  %566 = vmatpush.msra.mxu3 %v2557_v7  ;;  %v2585_v7 = vld [vmem:[#allocation2 + $0x448] sm:$0xff] }
  0xc2   :  { %530 = vmatpush.msra.mxu2 %v2545_v15  ;;  %3634 = vst [vmem:[#allocation46_spill] sm:$0xff] %v2553_v50  ;;  %v2569_v15 = vld [vmem:[#allocation2 + $0x460] sm:$0xff] }
  0xc3   :  { %v184_v62 = vpop.f32.mrf.mxu0  ;;  %495 = vmatpush.msra.mxu1 %v2535_v3  ;;  %3636 = vst [vmem:[#allocation48_spill] sm:$0xff] %v2559_v5  ;;  %v2561_v3 = vld [vmem:[#allocation2 + $0x468] sm:$0xff] }
  0xc4   :  { %374 = vmatmul.f32.gmra.mxu1 %v184_v62  ;;  %v2543_v62 = vld [vmem:[#allocation2 + $0x300] sm:$0xff]  ;;  %531 = vmatpush.msra.mxu2 %v2549_v48  ;;  %3637 = vst [vmem:[#allocation49_spill] sm:$0xff] %v2561_v3 }
  0xc5   :  { %3630 = vst [vmem:[#allocation42_spill] sm:$0xff] %v2543_v62  ;;  %496 = vmatpush.msra.mxu1 %v2543_v62  ;;  %567 = vmatpush.msra.mxu3 %v2561_v3  ;;  %v2575_v62 = vld [vmem:[#allocation2 + $0x458] sm:$0xff]  ;;  %v2583_v3 = vld [vmem:[#allocation2 + $0x388] sm:$0xff] }
  0xc6   :  { %532 = vmatpush.msra.mxu2 %v2553_v50  ;;  %3639 = vst [vmem:[#allocation51_spill] sm:$0xff] %v2569_v15  ;;  %v2577_v50 = vld [vmem:[#allocation2 + $0x390] sm:$0xff] }
  0xc7   :  { %568 = vmatpush.msra.mxu3 %v2569_v15  ;;  %3640 = vst [vmem:[#allocation52_spill] sm:$0xff] %v2573_v10  ;;  %v2599_v15 = vld [vmem:[#allocation2 + $0x430] sm:$0xff] }
  0xc8   :  { %533 = vmatpush.msra.mxu2 %v2559_v5  ;;  %3641 = vst [vmem:[#allocation53_spill] sm:$0xff] %v2575_v62  ;;  %v2581_v5 = vld [vmem:[#allocation2 + $0x450] sm:$0xff] }
  0xc9   :  { %3642 = vst [vmem:[#allocation54_spill] sm:$0xff] %v2577_v50  ;;  %569 = vmatpush.msra.mxu3 %v2575_v62  ;;  %v2597_v62 = vld [vmem:[#allocation2 + $0x438] sm:$0xff] }
  0xca   :  { %3643 = vst [vmem:[#allocation55_spill] sm:$0xff] %v2583_v3 }
  0xcb   :  { %v187_v1 = vpop.f32.mrf.mxu0  ;;  %570 = vmatpush.msra.mxu3 %v2581_v5 }
  0xcc   :  { %413 = vmatmul.f32.vlgmr.msrb.gmra.mxu2 %v187_v1  ;;  %v2567_v1 = vld [vmem:[#allocation2 + $0x3a0] sm:$0xff] }
  0xcd   :  { %3638 = vst [vmem:[#allocation50_spill] sm:$0xff] %v2567_v1  ;;  %534 = vmatpush.msra.mxu2 %v2567_v1  ;;  %571 = vmatpush.msra.mxu3 %v2585_v7  ;;  %v2593_v1 = vld [vmem:[#allocation2 + $0x440] sm:$0xff] }
  0xcf   :  { %535 = vmatpush.msra.mxu2 %v2573_v10  ;;  %572 = vmatpush.msra.mxu3 %v2593_v1 }
  0xd1   :  { %536 = vmatpush.msra.mxu2 %v2577_v50  ;;  %573 = vmatpush.msra.mxu3 %v2597_v62  ;;  %v2615_v50 = vld [vmem:[#allocation2 + $0x410] sm:$0xff] }
  0xd3   :  { %v190_v48 = vpop.f32.mrf.mxu0  ;;  %537 = vmatpush.msra.mxu2 %v2583_v3  ;;  %v2603_v3 = vld [vmem:[#allocation2 + $0x428] sm:$0xff]  ;;  %574 = vmatpush.msra.mxu3 %v2599_v15 }
  0xd4   :  { %416 = vmatmul.f32.gmra.mxu2 %v190_v48  ;;  %v2591_v48 = vld [vmem:[#allocation2 + $0x380] sm:$0xff] }
  0xd5   :  { %3644 = vst [vmem:[#allocation56_spill] sm:$0xff] %v2591_v48  ;;  %538 = vmatpush.msra.mxu2 %v2591_v48  ;;  %575 = vmatpush.msra.mxu3 %v2603_v3  ;;  %v2609_v48 = vld [vmem:[#allocation2 + $0x420] sm:$0xff] }
  0xd7   :  { %687 = vmatpush.msrb.mxu2 %v2273_v18  ;;  %576 = vmatpush.msra.mxu3 %v2609_v48  ;;  %v2613_v18 = vld [vmem:[#allocation2 + $0x418] sm:$0xff] }
  0xd9   :  { %688 = vmatpush.msrb.mxu2 %v2287_v22  ;;  %577 = vmatpush.msra.mxu3 %v2613_v18  ;;  %v2619_v22 = vld [vmem:[#allocation2 + $0x408] sm:$0xff] }
  0xdb   :  { %v193_v10 = vpop.f32.mrf.mxu0  ;;  %689 = vmatpush.msrb.mxu2 %v2291_v24  ;;  %578 = vmatpush.msra.mxu3 %v2615_v50  ;;  %v2625_v24 = vld [vmem:[#allocation2 + $0x400] sm:$0xff] }
  0xdc   :  { %455 = vmatmul.f32.vlgmr.msrb.gmra.mxu3 %v193_v10 }
  0xdd   :  { %690 = vmatpush.msrb.mxu2 %v2297_v26  ;;  %579 = vmatpush.msra.mxu3 %v2619_v22 }
  0xdf   :  { %691 = vmatpush.msrb.mxu2 %v2303_v28  ;;  %580 = vmatpush.msra.mxu3 %v2625_v24 }
  0xe1   :  { %692 = vmatpush.msrb.mxu2 %v2315_v31  ;;  %707 = vmatpush.msrb.mxu3 %v2245_v9  ;;  %v591_v9 = vld [vmem:[%s3510_s3 + $0x8] sm:$0xff]  ;;  %v2146_v31 = vmov 0  }
  0xe2   :  { %2060 = vset.pattern.permute.xlu0 %v2146_v31  ;;  %2061 = vset.pattern.permute.xlu1 %v2146_v31 }
  0xe3   :  { %v196_v10 = vpop.f32.mrf.mxu0  ;;  %693 = vmatpush.msrb.mxu2 %v2319_v33  ;;  %708 = vmatpush.msrb.mxu3 %v2252_v11  ;;  %v3653_v33 = vld [vmem:[#allocation19_spill] sm:$0xff] }
  0xe4   :  { %458 = vmatmul.f32.gmra.mxu3 %v196_v10  ;;  %599 = vperm.xlu0 %2060, %v591_v9  }
  0xe5   :  { %694 = vmatpush.msrb.mxu2 %v2327_v35  ;;  %709 = vmatpush.msrb.mxu3 %v2254_v12  ;;  %v590_v12 = vld [vmem:[%s3510_s3] sm:$0xff] }
  0xe7   :  { %695 = vmatpush.msrb.mxu2 %v2336_v38  ;;  %710 = vmatpush.msrb.mxu3 %v2257_v13 }
  0xe9   :  { %696 = vmatpush.msrb.mxu2 %v2340_v40  ;;  %711 = vmatpush.msrb.mxu3 %v2260_v14 }
  0xeb   :  { %v199_v26 = vpop.f32.mrf.mxu0  ;;  %697 = vmatpush.msrb.mxu2 %v2342_v42  ;;  %712 = vmatpush.msrb.mxu3 %v2268_v16 }
  0xec   :  { %497 = vmatmul.f32.vlgmr.msra.gmra.mxu1 %v199_v26  ;;  %594 = vperm.xlu0 %2060, %v590_v12  }
  0xed   :  { %698 = vmatpush.msrb.mxu2 %v2346_v44  ;;  %713 = vmatpush.msrb.mxu3 %v2270_v17  ;;  %v3645_v17 = vld [vmem:[#allocation12_spill] sm:$0xff] }
  0xef   :  { %699 = vmatpush.msrb.mxu2 %v2352_v47  ;;  %714 = vmatpush.msrb.mxu3 %v2275_v19  ;;  %v3646_v19 = vld [vmem:[#allocation11_spill] sm:$0xff] }
  0xf1   :  { %700 = vmatpush.msrb.mxu2 %v2356_v49  ;;  %715 = vmatpush.msrb.mxu3 %v2279_v20  ;;  %v3647_v20 = vld [vmem:[#allocation13_spill] sm:$0xff] }
  0xf3   :  { %v202_v28 = vpop.f32.mrf.mxu0  ;;  %701 = vmatpush.msrb.mxu2 %v2358_v51  ;;  %716 = vmatpush.msrb.mxu3 %v2289_v23  ;;  %v3648_v23 = vld [vmem:[#allocation14_spill] sm:$0xff] }
  0xf4   :  { %500 = vmatmul.f32.gmra.mxu1 %v202_v28 }
  0xf5   :  { %702 = vmatpush.msrb.mxu2 %v2362_v53  ;;  %717 = vmatpush.msrb.mxu3 %v2295_v25  ;;  %v3649_v25 = vld [vmem:[#allocation15_spill] sm:$0xff] }
  0xf7   :  { %718 = vmatpush.msrb.mxu3 %v2299_v27  ;;  %v3650_v27 = vld [vmem:[#allocation16_spill] sm:$0xff] }
  0xf9   :  { %719 = vmatpush.msrb.mxu3 %v2305_v29  ;;  %v3651_v29 = vld [vmem:[#allocation17_spill] sm:$0xff] }
  0xfb   :  { %v205_v11 = vpop.f32.mrf.mxu0  ;;  %720 = vmatpush.msrb.mxu3 %v2317_v32  ;;  %v3652_v32 = vld [vmem:[#allocation18_spill] sm:$0xff] }
  0xfc   :  { %539 = vmatmul.f32.vlgmr.msra.gmra.mxu2 %v205_v11 }
  0xfd   :  { %748 = vmatpush.msra.mxu2 %v2368_v57  ;;  %721 = vmatpush.msrb.mxu3 %v2323_v34  ;;  %v3654_v34 = vld [vmem:[#allocation20_spill] sm:$0xff] }
  0xff   :  { %749 = vmatpush.msra.mxu2 %v2371_v59  ;;  %722 = vmatpush.msrb.mxu3 %v2329_v36 }
 0x101   :  { %750 = vmatpush.msra.mxu2 %v2374_v61 }
 0x103   :  { %v208_v13 = vpop.f32.mrf.mxu0  ;;  %751 = vmatpush.msra.mxu2 %v2378_v63 }
 0x104   :  { %542 = vmatmul.f32.gmra.mxu2 %v208_v13 }
 0x105   :  { %752 = vmatpush.msra.mxu2 %v2384_v2 }
 0x107   :  { %753 = vmatpush.msra.mxu2 %v2387_v4 }
 0x109   :  { %754 = vmatpush.msra.mxu2 %v2390_v6 }
 0x10b   :  { %v211_v14 = vpop.f32.mrf.mxu0  ;;  %755 = vmatpush.msra.mxu2 %v2394_v8 }
 0x10c   :  { %581 = vmatmul.f32.vlgmr.msra.gmra.mxu3 %v211_v14  ;;  %v606_v14 = vld [vmem:[%s3511_s4] sm:$0xff] }
 0x10d   :  { %769 = vmatpush.msra.mxu3 %v2402_v30  ;;  %756 = vmatpush.msra.mxu2 %v2400_v21 }
 0x10f   :  { %770 = vmatpush.msra.mxu3 %v2408_v39  ;;  %757 = vmatpush.msra.mxu2 %v2404_v37  ;;  %v290_v36 = vpop.f32.mrf.mxu2 }
 0x111   :  { %771 = vmatpush.msra.mxu3 %v2413_v43  ;;  %758 = vmatpush.msra.mxu2 %v2411_v41 }
 0x113   :  { %v214_v16 = vpop.f32.mrf.mxu0  ;;  %772 = vmatpush.msra.mxu3 %v2421_v46  ;;  %759 = vmatpush.msra.mxu2 %v2419_v45 }
 0x114   :  { %584 = vmatmul.f32.gmra.mxu3 %v214_v16  ;;  %v3655_v16 = vld [vmem:[#allocation21_spill] sm:$0xff] }
 0x115   :  { %773 = vmatpush.msra.mxu3 %v2430_v54  ;;  %760 = vmatpush.msra.mxu2 %v2428_v52 }
 0x117   :  { %774 = vmatpush.msra.mxu3 %v2436_v56  ;;  %761 = vmatpush.msra.mxu2 %v2432_v55  ;;  %v293_v42 = vpop.f32.mrf.mxu2 }
 0x119   :  { %775 = vmatpush.msra.mxu3 %v2441_v60  ;;  %762 = vmatpush.msra.mxu2 %v2439_v58  ;;  %v267_v35 = vpop.f32.mrf.mxu1 }
 0x11a   :  { %v291_v63 = vadd.f32 %v290_v36, %v267_v35  ;;  %v609_v35 = vld [vmem:[%s3511_s4 + $0x18] sm:$0xff]  ;;  %v3664_v36 = vld [vmem:[#allocation32_spill] sm:$0xff] }
 0x11b   :  { %776 = vmatpush.msra.mxu3 %v3645_v17  ;;  %763 = vmatpush.msra.mxu2 %v3646_v19  ;;  %v3656_v17 = vld [vmem:[#allocation22_spill] sm:$0xff]  ;;  %v607_v19 = vld [vmem:[%s3511_s4 + $0x8] sm:$0xff] }
 0x11d   :  { %777 = vmatpush.msra.mxu3 %v3647_v20  ;;  %v3657_v20 = vld [vmem:[#allocation23_spill] sm:$0xff] }
 0x11f   :  { %778 = vmatpush.msra.mxu3 %v3648_v23  ;;  %v3658_v23 = vld [vmem:[#allocation24_spill] sm:$0xff] }
 0x121   :  { %779 = vmatpush.msra.mxu3 %v3649_v25  ;;  %v270_v40 = vpop.f32.mrf.mxu1  ;;  %v3659_v25 = vld [vmem:[#allocation25_spill] sm:$0xff] }
 0x122   :  { %v294_v4 = vadd.f32 %v293_v42, %v270_v40  ;;  %v3667_v40 = vld [vmem:[#allocation38_spill] sm:$0xff] }
 0x123   :  { %780 = vmatpush.msra.mxu3 %v3650_v27  ;;  %v608_v27 = vld [vmem:[%s3511_s4 + $0x10] sm:$0xff]  ;;  %v610_v42 = vld [vmem:[%s3511_s4 + $0x20] sm:$0xff] }
 0x125   :  { %781 = vmatpush.msra.mxu3 %v3651_v29  ;;  %v3660_v29 = vld [vmem:[#allocation26_spill] sm:$0xff] }
 0x127   :  { %782 = vmatpush.msra.mxu3 %v3652_v32  ;;  %v3661_v32 = vld [vmem:[#allocation27_spill] sm:$0xff] }
 0x129   :  { %783 = vmatpush.msra.mxu3 %v3653_v33  ;;  %v3662_v33 = vld [vmem:[#allocation28_spill] sm:$0xff] }
 0x12b   :  { %784 = vmatpush.msra.mxu3 %v3654_v34  ;;  %v3663_v34 = vld [vmem:[#allocation30_spill] sm:$0xff] }
 0x12f   :  { %v330_v38 = vpop.f32.mrf.mxu3 }
 0x130   :  { %v336_v6 = vadd.f32 %v330_v38, %v291_v63  ;;  %v3666_v38 = vld [vmem:[#allocation36_spill] sm:$0xff]  ;;  %v3671_v63 = vld [vmem:[#allocation47_spill] sm:$0xff] }
 0x137   :  { %v333_v44 = vpop.f32.mrf.mxu3 }
 0x138   :  { %v337_v8 = vadd.f32 %v333_v44, %v294_v4  ;;  %v3668_v44 = vld [vmem:[#allocation40_spill] sm:$0xff] }
 0x139   :  { %v372_v47 = vpop.f32.mrf.mxu1 }
 0x13a   :  { %v378_v21 = vadd.f32 %v372_v47, %v336_v6  ;;  %v3669_v47 = vld [vmem:[#allocation42_spill] sm:$0xff]  ;;  %v3673_v6 = vld [vmem:[#allocation51_spill] sm:$0xff] }
 0x141   :  { %v375_v53 = vpop.f32.mrf.mxu1 }
 0x142   :  { %v379_v37 = vadd.f32 %v375_v53, %v337_v8  ;;  %v613_v53 = vld [vmem:[%s3511_s4 + $0x38] sm:$0xff] }
 0x143   :  { %v3674_v8 = vld [vmem:[#allocation29_spill] sm:$0xff] }
 0x14f   :  { %v414_v49 = vpop.f32.mrf.mxu2 }
 0x150   :  { %v420_v39 = vadd.f32 %v414_v49, %v378_v21  ;;  %v611_v49 = vld [vmem:[%s3511_s4 + $0x28] sm:$0xff]  ;;  %v3675_v21 = vld [vmem:[#allocation53_spill] sm:$0xff] }
 0x156   :  { %v600_v30 = vpop.permute.xlu0 %599 }
 0x157   :  { %v417_v57 = vpop.f32.mrf.mxu2 }
 0x158   :  { %v421_v43 = vadd.f32 %v417_v57, %v379_v37  ;;  %v614_v57 = vld [vmem:[%s3511_s4 + $0x40] sm:$0xff]  ;;  %v3677_v37 = vld [vmem:[#allocation33_spill] sm:$0xff] }
 0x15e   :  { %v595_v26 = vpop.permute.xlu0 %594 }
 0x15f   :  { %v456_v51 = vpop.f32.mrf.mxu3 }
 0x160   :  { %v462_v45 = vadd.f32 %v456_v51, %v420_v39  ;;  %v612_v51 = vld [vmem:[%s3511_s4 + $0x30] sm:$0xff] }
 0x167   :  { %v459_v59 = vpop.f32.mrf.mxu3 }
 0x168   :  { %v463_v52 = vadd.f32 %v459_v59, %v421_v43  ;;  %v3679_v43 = vld [vmem:[#allocation37_spill] sm:$0xff] }
 0x169   :  { %v498_v61 = vpop.f32.mrf.mxu1 }
 0x16a   :  { %v504_v54 = vadd.f32 %v498_v61, %v462_v45  ;;  %v3670_v61 = vld [vmem:[#allocation45_spill] sm:$0xff]  ;;  %v3680_v45 = vld [vmem:[#allocation39_spill] sm:$0xff] }
 0x171   :  { %v501_v46 = vpop.f32.mrf.mxu1 }
 0x172   :  { %v505_v56 = vadd.f32 %v501_v46, %v463_v52  ;;  %v3681_v46 = vld [vmem:[#allocation41_spill] sm:$0xff]  ;;  %v3684_v52 = vld [vmem:[#allocation46_spill] sm:$0xff] }
 0x17f   :  { %v540_v2 = vpop.f32.mrf.mxu2 }
 0x180   :  { %v546_v58 = vadd.f32 %v540_v2, %v504_v54  ;;  %v3672_v2 = vld [vmem:[#allocation49_spill] sm:$0xff]  ;;  %v3687_v54 = vld [vmem:[#allocation52_spill] sm:$0xff] }
 0x187   :  { %v543_v55 = vpop.f32.mrf.mxu2 }
 0x188   :  { %v547_v60 = vadd.f32 %v543_v55, %v505_v56  ;;  %v3690_v56 = vld [vmem:[#allocation56_spill] sm:$0xff] }
 0x18f   :  { %v582_v41 = vpop.f32.mrf.mxu3 }
 0x190   :  { %v588_v10 = vadd.f32 %v582_v41, %v546_v58  ;;  %v3678_v41 = vld [vmem:[#allocation35_spill] sm:$0xff] }
 0x192   :  { %v602_v31 = vadd.f32 %v595_v26, %v588_v10  ;;  %v898_v10 = vld [vmem:[#allocation5 + $0x78] sm:$0xff]  ;;  %v895_v26 = vld [vmem:[#allocation5 + $0x60] sm:$0xff] }
 0x194   :  { %v604_v13 = vmax.f32 %v602_v31, 0.0  ;;  %v894_v31 = vld [vmem:[#allocation5 + $0x58] sm:$0xff] }
 0x197   :  { %v585_v28 = vpop.f32.mrf.mxu3 }
 0x198   :  { %v589_v9 = vadd.f32 %v585_v28, %v547_v60  ;;  %v897_v60 = vld [vmem:[#allocation5 + $0x70] sm:$0xff]  ;;  %v896_v28 = vld [vmem:[#allocation5 + $0x68] sm:$0xff] }
 0x19a   :  { %v603_v11 = vadd.f32 %v600_v30, %v589_v9  ;;  %v3676_v30 = vld [vmem:[#allocation31_spill] sm:$0xff]  ;;  %v893_v9 = vld [vmem:[#allocation5 + $0x50] sm:$0xff] }
 0x19c   :  { %v605_v12 = vmax.f32 %v603_v11, 0.0  ;;  %v891_v11 = vld [vmem:[#allocation5 + $0x40] sm:$0xff] }
 0x19e   :  { %657 = vmatpush.msrb.mxu1 %v605_v12  ;;  %v892_v12 = vld [vmem:[#allocation5 + $0x48] sm:$0xff] }
 0x1a0   :  { %658 = vmatpush.msrb.mxu1 %v604_v13  ;;  %v889_v13 = vld [vmem:[#allocation5 + $0x30] sm:$0xff] }
 0x1a1   :  { %2010 = vmatmul.msk.f32.vlgmr.msrb.gmra.mxu1 %vm615_vm2, %v606_v14  ;;  %v890_v14 = vld [vmem:[#allocation5 + $0x38] sm:$0xff] }
 0x1a2   :  { %811 = vmatpush.msra.mxu1 %v3655_v16  ;;  %v887_v16 = vld [vmem:[#allocation5 + $0x20] sm:$0xff] }
 0x1a4   :  { %812 = vmatpush.msra.mxu1 %v3656_v17  ;;  %v888_v17 = vld [vmem:[#allocation5 + $0x28] sm:$0xff] }
 0x1a6   :  { %813 = vmatpush.msra.mxu1 %v3657_v20  ;;  %v886_v20 = vld [vmem:[#allocation5 + $0x18] sm:$0xff] }
 0x1a8   :  { %814 = vmatpush.msra.mxu1 %v3658_v23  ;;  %v883_v23 = vld [vmem:[#allocation5] sm:$0xff] }
 0x1a9   :  { %2011 = vmatmul.msk.f32.gmra.mxu1 %vm615_vm2, %v607_v19  ;;  %v885_v19 = vld [vmem:[#allocation5 + $0x10] sm:$0xff] }
 0x1aa   :  { %815 = vmatpush.msra.mxu1 %v3659_v25  ;;  %v884_v25 = vld [vmem:[#allocation5 + $0x8] sm:$0xff] }
 0x1ac   :  { %816 = vmatpush.msra.mxu1 %v2492_v0  ;;  %v3665_v0 = vld [vmem:[#allocation34_spill] sm:$0xff] }
 0x1ae   :  { %817 = vmatpush.msra.mxu1 %v3660_v29  ;;  %v1016_v29 = vld [vmem:[#allocation5 + $0xf8] sm:$0xff] }
 0x1b0   :  { %818 = vmatpush.msra.mxu1 %v3661_v32  ;;  %v1013_v32 = vld [vmem:[#allocation5 + $0xe0] sm:$0xff] }
 0x1b1   :  { %2012 = vmatmul.msk.f32.gmra.mxu1 %vm615_vm2, %v608_v27  ;;  %v1015_v27 = vld [vmem:[#allocation5 + $0xf0] sm:$0xff] }
 0x1b2   :  { %819 = vmatpush.msra.mxu1 %v3662_v33  ;;  %v1014_v33 = vld [vmem:[#allocation5 + $0xe8] sm:$0xff] }
 0x1b4   :  { %820 = vmatpush.msra.mxu1 %v3663_v34  ;;  %v1011_v34 = vld [vmem:[#allocation5 + $0xd0] sm:$0xff] }
 0x1b6   :  { %821 = vmatpush.msra.mxu1 %v3664_v36  ;;  %v1009_v36 = vld [vmem:[#allocation5 + $0xc0] sm:$0xff] }
 0x1b8   :  { %822 = vmatpush.msra.mxu1 %v3665_v0  ;;  %v1010_v0 = vld [vmem:[#allocation5 + $0xc8] sm:$0xff] }
 0x1b9   :  { %2013 = vmatmul.msk.f32.gmra.mxu1 %vm615_vm2, %v609_v35  ;;  %v1012_v35 = vld [vmem:[#allocation5 + $0xd8] sm:$0xff] }
 0x1ba   :  { %823 = vmatpush.msra.mxu1 %v3666_v38  ;;  %v1007_v38 = vld [vmem:[#allocation5 + $0xb0] sm:$0xff] }
 0x1bc   :  { %824 = vmatpush.msra.mxu1 %v3667_v40  ;;  %v1008_v40 = vld [vmem:[#allocation5 + $0xb8] sm:$0xff] }
 0x1be   :  { %825 = vmatpush.msra.mxu1 %v3668_v44  ;;  %v1006_v44 = vld [vmem:[#allocation5 + $0xa8] sm:$0xff] }
 0x1c0   :  { %826 = vmatpush.msra.mxu1 %v3669_v47  ;;  %v1003_v47 = vld [vmem:[#allocation5 + $0x90] sm:$0xff] }
 0x1c1   :  { %2014 = vmatmul.msk.f32.gmra.mxu1 %vm615_vm2, %v610_v42  ;;  %v1005_v42 = vld [vmem:[#allocation5 + $0xa0] sm:$0xff] }
 0x1c2   :  { %931 = vmatpush.msrb.mxu1 %v898_v10 }
 0x1c4   :  { %932 = vmatpush.msrb.mxu1 %v896_v28 }
 0x1c6   :  { %933 = vmatpush.msrb.mxu1 %v894_v31 }
 0x1c8   :  { %934 = vmatpush.msrb.mxu1 %v892_v12 }
 0x1c9   :  { %2015 = vmatmul.msk.f32.gmra.mxu1 %vm615_vm2, %v611_v49  ;;  %v1004_v49 = vld [vmem:[#allocation5 + $0x98] sm:$0xff] }
 0x1ca   :  { %935 = vmatpush.msrb.mxu1 %v890_v14 }
 0x1cc   :  { %936 = vmatpush.msrb.mxu1 %v888_v17 }
 0x1ce   :  { %937 = vmatpush.msrb.mxu1 %v886_v20 }
 0x1d0   :  { %938 = vmatpush.msrb.mxu1 %v884_v25 }
 0x1d1   :  { %2016 = vmatmul.msk.f32.gmra.mxu1 %vm615_vm2, %v612_v51  ;;  %v1001_v51 = vld [vmem:[#allocation5 + $0x80] sm:$0xff] }
 0x1d9   :  { %2017 = vmatmul.msk.f32.gmra.mxu1 %vm615_vm2, %v613_v53  ;;  %v1002_v53 = vld [vmem:[#allocation5 + $0x88] sm:$0xff] }
 0x1e1   :  { %2018 = vmatmul.msk.f32.gmra.mxu1 %vm615_vm2, %v614_v57 }
 0x21e   :  { %v660_v59 = vpop.f32.mrf.mxu1 }
 0x21f   :  { %723 = vmatmul.f32.vlgmr.msrb.gmra.mxu3 %v660_v59 }
 0x220   :  { %853 = vmatpush.msrb.mxu3 %v3670_v61 }
 0x222   :  { %854 = vmatpush.msrb.mxu3 %v3671_v63 }
 0x224   :  { %855 = vmatpush.msrb.mxu3 %v3672_v2 }
 0x226   :  { %v663_v4 = vpop.f32.mrf.mxu1  ;;  %856 = vmatpush.msrb.mxu3 %v3673_v6 }
 0x227   :  { %703 = vmatmul.f32.vlgmr.msrb.gmra.mxu2 %v663_v4 }
 0x228   :  { %832 = vmatpush.msrb.mxu2 %v3674_v8  ;;  %857 = vmatpush.msrb.mxu3 %v3675_v21 }
 0x22a   :  { %833 = vmatpush.msrb.mxu2 %v3676_v30  ;;  %858 = vmatpush.msrb.mxu3 %v2581_v5 }
 0x22c   :  { %834 = vmatpush.msrb.mxu2 %v3677_v37  ;;  %859 = vmatpush.msrb.mxu3 %v2585_v7  ;;  %v3682_v7 = vld [vmem:[#allocation43_spill] sm:$0xff] }
 0x22e   :  { %v666_v39 = vpop.f32.mrf.mxu1  ;;  %835 = vmatpush.msrb.mxu2 %v3678_v41  ;;  %860 = vmatpush.msrb.mxu3 %v2593_v1  ;;  %v3683_v1 = vld [vmem:[#allocation44_spill] sm:$0xff] }
 0x22f   :  { %743 = vmatmul.f32.vlgmr.msrb.gmra.mxu0 %v666_v39 }
 0x230   :  { %836 = vmatpush.msrb.mxu2 %v3679_v43  ;;  %861 = vmatpush.msrb.mxu3 %v2597_v62  ;;  %v3685_v62 = vld [vmem:[#allocation48_spill] sm:$0xff] }
 0x231   :  { %911 = vmatpush.msrb.mxu0 %v897_v60 }
 0x232   :  { %837 = vmatpush.msrb.mxu2 %v3680_v45  ;;  %862 = vmatpush.msrb.mxu3 %v2599_v15 }
 0x233   :  { %912 = vmatpush.msrb.mxu0 %v895_v26 }
 0x234   :  { %838 = vmatpush.msrb.mxu2 %v3681_v46  ;;  %863 = vmatpush.msrb.mxu3 %v2603_v3  ;;  %v3686_v3 = vld [vmem:[#allocation50_spill] sm:$0xff] }
 0x235   :  { %913 = vmatpush.msrb.mxu0 %v893_v9 }
 0x236   :  { %v669_v5 = vpop.f32.mrf.mxu1  ;;  %839 = vmatpush.msrb.mxu2 %v3682_v7  ;;  %864 = vmatpush.msrb.mxu3 %v2609_v48  ;;  %v874_v48 = vld [vmem:[%s3512_s5] sm:$0xff]  ;;  %s2147_s5 = smov 64  }
 0x237   :  { %764 = vmatmul.f32.vlgmr.msra.gmra.mxu2 %v669_v5  ;;  %877 = vperm.xlu1 %2061, %v874_v48  }
 0x238   :  { %840 = vmatpush.msrb.mxu2 %v3683_v1  ;;  %865 = vmatpush.msrb.mxu3 %v2613_v18  ;;  %v3688_v18 = vld [vmem:[#allocation54_spill] sm:$0xff] }
 0x239   :  { %914 = vmatpush.msrb.mxu0 %v891_v11 }
 0x23a   :  { %841 = vmatpush.msrb.mxu2 %v3684_v52  ;;  %866 = vmatpush.msrb.mxu3 %v2615_v50  ;;  %v3689_v50 = vld [vmem:[#allocation55_spill] sm:$0xff] }
 0x23b   :  { %915 = vmatpush.msrb.mxu0 %v889_v13 }
 0x23c   :  { %842 = vmatpush.msrb.mxu2 %v3685_v62  ;;  %867 = vmatpush.msrb.mxu3 %v2619_v22  ;;  %v2778_v62 = vld [vmem:[#allocation5 + $0x170] sm:$0xff] }
 0x23d   :  { %916 = vmatpush.msrb.mxu0 %v887_v16 }
 0x23e   :  { %v672_v15 = vpop.f32.mrf.mxu1  ;;  %843 = vmatpush.msrb.mxu2 %v3686_v3  ;;  %868 = vmatpush.msrb.mxu3 %v2625_v24 }
 0x23f   :  { %785 = vmatmul.f32.vlgmr.msra.gmra.mxu3 %v672_v15  ;;  %917 = vmatpush.msrb.mxu0 %v885_v19  ;;  %v2780_v15 = vld [vmem:[#allocation5 + $0x178] sm:$0xff] }
 0x240   :  { %844 = vmatpush.msrb.mxu2 %v3687_v54  ;;  %982 = vmatpush.msra.mxu3 %v898_v10  ;;  %v2786_v54 = vld [vmem:[#allocation5 + $0x160] sm:$0xff] }
 0x241   :  { %918 = vmatpush.msrb.mxu0 %v883_v23 }
 0x242   :  { %845 = vmatpush.msrb.mxu2 %v3688_v18  ;;  %983 = vmatpush.msra.mxu3 %v896_v28  ;;  %v2790_v18 = vld [vmem:[#allocation5 + $0x168] sm:$0xff]  ;;  %v2822_v28 = vld [vmem:[#allocation5 + $0x120] sm:$0xff] }
 0x244   :  { %846 = vmatpush.msrb.mxu2 %v3689_v50  ;;  %984 = vmatpush.msra.mxu3 %v894_v31  ;;  %v2795_v50 = vld [vmem:[#allocation5 + $0x150] sm:$0xff] }
 0x245   :  { %v2831_v31 = vld [vmem:[#allocation5 + $0x110] sm:$0xff] }
 0x246   :  { %v675_v55 = vpop.f32.mrf.mxu1  ;;  %847 = vmatpush.msrb.mxu2 %v3690_v56  ;;  %985 = vmatpush.msra.mxu3 %v892_v12  ;;  %v2802_v56 = vld [vmem:[#allocation5 + $0x140] sm:$0xff] }
 0x247   :  { %806 = vmatmul.f32.vlgmr.msra.gmra.mxu0 %v675_v55  ;;  %v2799_v55 = vld [vmem:[#allocation5 + $0x158] sm:$0xff]  ;;  %v2837_v12 = vld [vmem:[#allocation5 + $0x100] sm:$0xff] }
 0x248   :  { %962 = vmatpush.msra.mxu2 %v897_v60  ;;  %986 = vmatpush.msra.mxu3 %v890_v14  ;;  %v2813_v60 = vld [vmem:[#allocation5 + $0x138] sm:$0xff]  ;;  %v2843_v14 = vld [vmem:[#allocation5 + $0x1f0] sm:$0xff] }
 0x249   :  { %1028 = vmatpush.msra.mxu0 %v1015_v27 }
 0x24a   :  { %963 = vmatpush.msra.mxu2 %v895_v26  ;;  %987 = vmatpush.msra.mxu3 %v888_v17 }
 0x24b   :  { %1029 = vmatpush.msra.mxu0 %v1013_v32 }
 0x24c   :  { %964 = vmatpush.msra.mxu2 %v893_v9  ;;  %988 = vmatpush.msra.mxu3 %v886_v20  ;;  %v2824_v9 = vld [vmem:[#allocation5 + $0x128] sm:$0xff] }
 0x24d   :  { %1030 = vmatpush.msra.mxu0 %v1011_v34  ;;  %v2855_v20 = vld [vmem:[#allocation5 + $0x1e8] sm:$0xff] }
 0x24e   :  { %v678_v22 = vpop.f32.mrf.mxu1  ;;  %965 = vmatpush.msra.mxu2 %v891_v11  ;;  %989 = vmatpush.msra.mxu3 %v884_v25  ;;  %v2833_v11 = vld [vmem:[#allocation5 + $0x118] sm:$0xff]  ;;  %v2862_v25 = vld [vmem:[#allocation5 + $0x1d0] sm:$0xff] }
 0x24f   :  { %827 = vmatmul.f32.vlgmr.msra.gmra.mxu1 %v678_v22  ;;  %1031 = vmatpush.msra.mxu0 %v1009_v36  ;;  %v2805_v22 = vld [vmem:[#allocation5 + $0x148] sm:$0xff] }
 0x250   :  { %966 = vmatpush.msra.mxu2 %v889_v13  ;;  %1048 = vmatpush.msra.mxu1 %v1016_v29  ;;  %v2839_v13 = vld [vmem:[#allocation5 + $0x108] sm:$0xff] }
 0x251   :  { %1032 = vmatpush.msra.mxu0 %v1007_v38 }
 0x252   :  { %967 = vmatpush.msra.mxu2 %v887_v16  ;;  %1049 = vmatpush.msra.mxu1 %v1014_v33  ;;  %v2845_v16 = vld [vmem:[#allocation5 + $0x1f8] sm:$0xff] }
 0x253   :  { %1033 = vmatpush.msra.mxu0 %v1005_v42 }
 0x254   :  { %968 = vmatpush.msra.mxu2 %v885_v19  ;;  %1050 = vmatpush.msra.mxu1 %v1012_v35  ;;  %v2851_v19 = vld [vmem:[#allocation5 + $0x1e0] sm:$0xff] }
 0x255   :  { %1034 = vmatpush.msra.mxu0 %v1003_v47 }
 0x256   :  { %v681_v58 = vpop.f32.mrf.mxu1  ;;  %969 = vmatpush.msra.mxu2 %v883_v23  ;;  %1051 = vmatpush.msra.mxu1 %v1010_v0 }
 0x257   :  { %848 = vmatmul.f32.vlgmr.msrb.gmra.mxu2 %v681_v58  ;;  %1035 = vmatpush.msra.mxu0 %v1001_v51 }
 0x258   :  { %1078 = vmatpush.msrb.mxu2 %v1015_v27  ;;  %1052 = vmatpush.msra.mxu1 %v1008_v40  ;;  %v2866_v27 = vld [vmem:[#allocation5 + $0x1d8] sm:$0xff] }
 0x25a   :  { %1079 = vmatpush.msrb.mxu2 %v1013_v32  ;;  %1053 = vmatpush.msra.mxu1 %v1006_v44  ;;  %v2874_v32 = vld [vmem:[#allocation5 + $0x1c8] sm:$0xff] }
 0x25c   :  { %1080 = vmatpush.msrb.mxu2 %v1011_v34  ;;  %1054 = vmatpush.msra.mxu1 %v1004_v49  ;;  %v2880_v34 = vld [vmem:[#allocation5 + $0x1b8] sm:$0xff] }
 0x25e   :  { %v684_v24 = vpop.f32.mrf.mxu1  ;;  %1081 = vmatpush.msrb.mxu2 %v1009_v36  ;;  %1055 = vmatpush.msra.mxu1 %v1002_v53  ;;  %v2886_v36 = vld [vmem:[#allocation5 + $0x1a8] sm:$0xff] }
 0x25f   :  { %869 = vmatmul.f32.vlgmr.msrb.gmra.mxu3 %v684_v24  ;;  %v2811_v24 = vld [vmem:[#allocation5 + $0x130] sm:$0xff] }
 0x260   :  { %1098 = vmatpush.msrb.mxu3 %v1016_v29  ;;  %1082 = vmatpush.msrb.mxu2 %v1007_v38  ;;  %v2871_v29 = vld [vmem:[#allocation5 + $0x1c0] sm:$0xff]  ;;  %v2892_v38 = vld [vmem:[#allocation5 + $0x198] sm:$0xff] }
 0x262   :  { %1099 = vmatpush.msrb.mxu3 %v1014_v33  ;;  %1083 = vmatpush.msrb.mxu2 %v1005_v42  ;;  %v2877_v33 = vld [vmem:[#allocation5 + $0x1b0] sm:$0xff]  ;;  %v2898_v42 = vld [vmem:[#allocation5 + $0x188] sm:$0xff] }
 0x264   :  { %1100 = vmatpush.msrb.mxu3 %v1012_v35  ;;  %1084 = vmatpush.msrb.mxu2 %v1003_v47  ;;  %v2883_v35 = vld [vmem:[#allocation5 + $0x1a0] sm:$0xff]  ;;  %v2904_v47 = vld [vmem:[#allocation5 + $0x278] sm:$0xff] }
 0x266   :  { %1101 = vmatpush.msrb.mxu3 %v1010_v0  ;;  %1085 = vmatpush.msrb.mxu2 %v1001_v51  ;;  %v2889_v0 = vld [vmem:[#allocation5 + $0x190] sm:$0xff]  ;;  %v2914_v51 = vld [vmem:[#allocation5 + $0x268] sm:$0xff] }
 0x268   :  { %1102 = vmatpush.msrb.mxu3 %v1008_v40  ;;  %v2895_v40 = vld [vmem:[#allocation5 + $0x180] sm:$0xff] }
 0x26a   :  { %1103 = vmatpush.msrb.mxu3 %v1006_v44  ;;  %v2901_v44 = vld [vmem:[#allocation5 + $0x270] sm:$0xff] }
 0x26c   :  { %1104 = vmatpush.msrb.mxu3 %v1004_v49  ;;  %v2909_v49 = vld [vmem:[#allocation5 + $0x260] sm:$0xff] }
 0x26e   :  { %1105 = vmatpush.msrb.mxu3 %v1002_v53  ;;  %v2917_v53 = vld [vmem:[#allocation5 + $0x250] sm:$0xff] }
 0x2a2   :  { %v724_v59 = vpop.f32.mrf.mxu3 }
 0x2a9   :  { %v878_v5 = vpop.permute.xlu1 %877 }
 0x2aa   :  { %v704_v57 = vpop.f32.mrf.mxu2 }
 0x2ab   :  { %v725_v61 = vadd.f32 %v724_v59, %v704_v57  ;;  %v2920_v57 = vld [vmem:[#allocation5 + $0x258] sm:$0xff]  ;;  %v2923_v59 = vld [vmem:[#allocation5 + $0x240] sm:$0xff] }
 0x2ac   :  { %v744_v63 = vpop.f32.mrf.mxu0 }
 0x2ad   :  { %v747_v4 = vadd.f32 %v744_v63, %v725_v61  ;;  %v2926_v61 = vld [vmem:[#allocation5 + $0x248] sm:$0xff]  ;;  %v2929_v63 = vld [vmem:[#allocation5 + $0x230] sm:$0xff] }
 0x2ba   :  { %v765_v2 = vpop.f32.mrf.mxu2 }
 0x2bb   :  { %v768_v8 = vadd.f32 %v765_v2, %v747_v4  ;;  %v2932_v2 = vld [vmem:[#allocation5 + $0x238] sm:$0xff]  ;;  %v2935_v4 = vld [vmem:[#allocation5 + $0x220] sm:$0xff] }
 0x2c2   :  { %v786_v6 = vpop.f32.mrf.mxu3 }
 0x2c3   :  { %v789_v21 = vadd.f32 %v786_v6, %v768_v8  ;;  %v2938_v6 = vld [vmem:[#allocation5 + $0x228] sm:$0xff]  ;;  %v2941_v8 = vld [vmem:[#allocation5 + $0x210] sm:$0xff] }
 0x2c4   :  { %v807_v30 = vpop.f32.mrf.mxu0 }
 0x2c5   :  { %v810_v39 = vadd.f32 %v807_v30, %v789_v21  ;;  %v2944_v21 = vld [vmem:[#allocation5 + $0x218] sm:$0xff]  ;;  %v2947_v30 = vld [vmem:[#allocation5 + $0x200] sm:$0xff] }
 0x2cc   :  { %v828_v37 = vpop.f32.mrf.mxu1 }
 0x2cd   :  { %v831_v43 = vadd.f32 %v828_v37, %v810_v39  ;;  %v2950_v37 = vld [vmem:[#allocation5 + $0x208] sm:$0xff]  ;;  %v2953_v39 = vld [vmem:[#allocation5 + $0x2f0] sm:$0xff] }
 0x2da   :  { %v849_v41 = vpop.f32.mrf.mxu2 }
 0x2db   :  { %v852_v45 = vadd.f32 %v849_v41, %v831_v43  ;;  %v2956_v41 = vld [vmem:[#allocation5 + $0x2f8] sm:$0xff]  ;;  %v2961_v43 = vld [vmem:[#allocation5 + $0x2e0] sm:$0xff] }
 0x2e2   :  { %v870_v46 = vpop.f32.mrf.mxu3 }
 0x2e3   :  { %v873_v7 = vadd.f32 %v870_v46, %v852_v45  ;;  %v2966_v45 = vld [vmem:[#allocation5 + $0x2e8] sm:$0xff]  ;;  %v2969_v46 = vld [vmem:[#allocation5 + $0x2d0] sm:$0xff] }
 0x2e5   :  { %v880_v1 = vadd.f32 %v878_v5, %v873_v7  ;;  %v2972_v5 = vld [vmem:[#allocation5 + $0x2d8] sm:$0xff]  ;;  %v2975_v7 = vld [vmem:[#allocation5 + $0x2c0] sm:$0xff] }
 0x2e6   :  { %3691 = vst [vmem:[#allocation12_spill] sm:$0xff] %v2972_v5 }
 0x2e7   :  { %v881_v52 = vmax.f32 %v880_v1, 0.0  ;;  %3692 = vst [vmem:[#allocation11_spill] sm:$0xff] %v2975_v7  ;;  %v2978_v1 = vld [vmem:[#allocation5 + $0x2c8] sm:$0xff] }
 0x2e8   :  { %3693 = vst [vmem:[#allocation13_spill] sm:$0xff] %v2978_v1 }
 0x2e9   :  { %950 = vrot.lane.b32.xlu1 %v881_v52, %s2147_s5  ;;  %2019 = vmatmul.msk.f32.vlgmr.msrb.gmra.mxu0 %vm899_vm3, %v881_v52  ;;  %v2784_v3 = vrot.slane %v881_v52, 3  ;;  %v1017_v48 = vrot.slane %v881_v52, 1  ;;  %v2808_v58 = vrot.slane %v881_v52, 4  ;;  %v2820_v10 = vrot.slane %v881_v52, 6 }
 0x2ea   :  { %2020 = vmatmul.msk.f32.vlgmr.msrb.gmra.mxu1 %vm899_vm3, %v881_v52  ;;  %1144 = vmatpush.msrb.mxu0 %v2778_v62  ;;  %v1133_v26 = vrot.slane %v881_v52, 2  ;;  %v2849_v17 = vrot.slane %v881_v52, 7  ;;  %v2860_v23 = vrot.slane %v881_v52, 5  ;;  %v2981_v52 = vld [vmem:[#allocation5 + $0x2b0] sm:$0xff] }
 0x2eb   :  { %1164 = vmatpush.msrb.mxu1 %v2780_v15  ;;  %1298 = vrot.lane.b32.xlu0 %v2784_v3, %s2147_s5  ;;  %3694 = vst [vmem:[#allocation14_spill] sm:$0xff] %v2981_v52 }
 0x2ec   :  { %1066 = vrot.lane.b32.xlu2 %v1017_v48, %s2147_s5  ;;  %1145 = vmatpush.msrb.mxu0 %v2786_v54 }
 0x2ed   :  { %1165 = vmatpush.msrb.mxu1 %v2790_v18 }
 0x2ee   :  { %1146 = vmatpush.msrb.mxu0 %v2795_v50 }
 0x2ef   :  { %1166 = vmatpush.msrb.mxu1 %v2799_v55 }
 0x2f0   :  { %1147 = vmatpush.msrb.mxu0 %v2802_v56 }
 0x2f1   :  { %1167 = vmatpush.msrb.mxu1 %v2805_v22  ;;  %1414 = vrot.lane.b32.xlu1 %v2808_v58, %s2147_s5 }
 0x2f2   :  { %2023 = vmatmul.msk.f32.vlgmr.msra.gmra.mxu0 %vm899_vm3, %v1017_v48  ;;  %2024 = vmatmul.msk.f32.vlgmr.msra.gmra.mxu1 %vm899_vm3, %v1017_v48  ;;  %v2987_v48 = vld [vmem:[#allocation5 + $0x2a0] sm:$0xff] }
 0x2f3   :  { %1148 = vmatpush.msrb.mxu0 %v2811_v24  ;;  %1168 = vmatpush.msrb.mxu1 %v2813_v60  ;;  %3696 = vst [vmem:[#allocation16_spill] sm:$0xff] %v2987_v48 }
 0x2f4   :  { %1646 = vrot.lane.b32.xlu0 %v2820_v10, %s2147_s5  ;;  %1182 = vrot.lane.b32.xlu2 %v1133_v26, %s2147_s5 }
 0x2f5   :  { %1149 = vmatpush.msrb.mxu0 %v2822_v28  ;;  %1169 = vmatpush.msrb.mxu1 %v2824_v9 }
 0x2f7   :  { %1150 = vmatpush.msrb.mxu0 %v2831_v31  ;;  %1170 = vmatpush.msrb.mxu1 %v2833_v11 }
 0x2f9   :  { %1151 = vmatpush.msrb.mxu0 %v2837_v12  ;;  %1171 = vmatpush.msrb.mxu1 %v2839_v13 }
 0x2fa   :  { %1762 = vrot.lane.b32.xlu1 %v2849_v17, %s2147_s5  ;;  %2027 = vmatmul.msk.f32.vlgmr.msrb.gmra.mxu0 %vm899_vm3, %v1133_v26 }
 0x2fb   :  { %1260 = vmatpush.msra.mxu0 %v2843_v14  ;;  %1280 = vmatpush.msra.mxu1 %v2845_v16 }
 0x2fc   :  { %2028 = vmatmul.msk.f32.vlgmr.msrb.gmra.mxu1 %vm899_vm3, %v1133_v26  ;;  %1530 = vrot.lane.b32.xlu2 %v2860_v23, %s2147_s5  ;;  %v2993_v26 = vld [vmem:[#allocation5 + $0x290] sm:$0xff] }
 0x2fd   :  { %1261 = vmatpush.msra.mxu0 %v2851_v19  ;;  %1281 = vmatpush.msra.mxu1 %v2855_v20  ;;  %3698 = vst [vmem:[#allocation18_spill] sm:$0xff] %v2993_v26 }
 0x2ff   :  { %1262 = vmatpush.msra.mxu0 %v2862_v25  ;;  %1282 = vmatpush.msra.mxu1 %v2866_v27 }
 0x301   :  { %1263 = vmatpush.msra.mxu0 %v2871_v29  ;;  %1283 = vmatpush.msra.mxu1 %v2874_v32 }
 0x303   :  { %1264 = vmatpush.msra.mxu0 %v2877_v33  ;;  %1284 = vmatpush.msra.mxu1 %v2880_v34 }
 0x305   :  { %1265 = vmatpush.msra.mxu0 %v2883_v35  ;;  %1285 = vmatpush.msra.mxu1 %v2886_v36 }
 0x307   :  { %1266 = vmatpush.msra.mxu0 %v2889_v0  ;;  %1286 = vmatpush.msra.mxu1 %v2892_v38 }
 0x309   :  { %1267 = vmatpush.msra.mxu0 %v2895_v40  ;;  %1287 = vmatpush.msra.mxu1 %v2898_v42 }
 0x30a   :  { %2031 = vmatmul.msk.f32.vlgmr.msra.gmra.mxu0 %vm899_vm3, %v2784_v3  ;;  %2032 = vmatmul.msk.f32.vlgmr.msra.gmra.mxu1 %vm899_vm3, %v2784_v3  ;;  %v2984_v3 = vld [vmem:[#allocation5 + $0x2b8] sm:$0xff] }
 0x30b   :  { %1376 = vmatpush.msrb.mxu0 %v2901_v44  ;;  %1396 = vmatpush.msrb.mxu1 %v2904_v47  ;;  %3695 = vst [vmem:[#allocation15_spill] sm:$0xff] %v2984_v3 }
 0x30d   :  { %1377 = vmatpush.msrb.mxu0 %v2909_v49  ;;  %1397 = vmatpush.msrb.mxu1 %v2914_v51 }
 0x30f   :  { %1378 = vmatpush.msrb.mxu0 %v2917_v53  ;;  %1398 = vmatpush.msrb.mxu1 %v2920_v57 }
 0x311   :  { %1379 = vmatpush.msrb.mxu0 %v2923_v59  ;;  %1399 = vmatpush.msrb.mxu1 %v2926_v61 }
 0x313   :  { %1380 = vmatpush.msrb.mxu0 %v2929_v63  ;;  %1400 = vmatpush.msrb.mxu1 %v2932_v2 }
 0x315   :  { %1381 = vmatpush.msrb.mxu0 %v2935_v4  ;;  %1401 = vmatpush.msrb.mxu1 %v2938_v6 }
 0x317   :  { %1382 = vmatpush.msrb.mxu0 %v2941_v8  ;;  %1402 = vmatpush.msrb.mxu1 %v2944_v21 }
 0x319   :  { %1383 = vmatpush.msrb.mxu0 %v2947_v30  ;;  %1403 = vmatpush.msrb.mxu1 %v2950_v37 }
 0x31a   :  { %2035 = vmatmul.msk.f32.vlgmr.msrb.gmra.mxu0 %vm899_vm3, %v2808_v58  ;;  %2036 = vmatmul.msk.f32.vlgmr.msrb.gmra.mxu1 %vm899_vm3, %v2808_v58  ;;  %v2990_v58 = vld [vmem:[#allocation5 + $0x2a8] sm:$0xff] }
 0x31b   :  { %1492 = vmatpush.msra.mxu0 %v2953_v39  ;;  %1512 = vmatpush.msra.mxu1 %v2956_v41  ;;  %3697 = vst [vmem:[#allocation17_spill] sm:$0xff] %v2990_v58 }
 0x31d   :  { %1493 = vmatpush.msra.mxu0 %v2961_v43  ;;  %1513 = vmatpush.msra.mxu1 %v2966_v45 }
 0x31f   :  { %1494 = vmatpush.msra.mxu0 %v2969_v46  ;;  %1514 = vmatpush.msra.mxu1 %v2972_v5  ;;  %v2996_v5 = vld [vmem:[#allocation5 + $0x298] sm:$0xff] }
 0x320   :  { %3699 = vst [vmem:[#allocation19_spill] sm:$0xff] %v2996_v5 }
 0x321   :  { %1495 = vmatpush.msra.mxu0 %v2975_v7  ;;  %1515 = vmatpush.msra.mxu1 %v2978_v1  ;;  %v2999_v7 = vld [vmem:[#allocation5 + $0x280] sm:$0xff]  ;;  %v3002_v1 = vld [vmem:[#allocation5 + $0x288] sm:$0xff] }
 0x322   :  { %3700 = vst [vmem:[#allocation20_spill] sm:$0xff] %v2999_v7 }
 0x323   :  { %1496 = vmatpush.msra.mxu0 %v2981_v52  ;;  %1516 = vmatpush.msra.mxu1 %v2984_v3  ;;  %3701 = vst [vmem:[#allocation21_spill] sm:$0xff] %v3002_v1  ;;  %v3005_v52 = vld [vmem:[#allocation5 + $0x370] sm:$0xff]  ;;  %v3008_v3 = vld [vmem:[#allocation5 + $0x378] sm:$0xff] }
 0x324   :  { %3702 = vst [vmem:[#allocation22_spill] sm:$0xff] %v3008_v3 }
 0x325   :  { %1497 = vmatpush.msra.mxu0 %v2987_v48  ;;  %1517 = vmatpush.msra.mxu1 %v2990_v58  ;;  %v3013_v58 = vld [vmem:[#allocation5 + $0x360] sm:$0xff]  ;;  %v3030_v48 = vld [vmem:[#allocation5 + $0x348] sm:$0xff] }
 0x326   :  { %3703 = vst [vmem:[#allocation23_spill] sm:$0xff] %v3013_v58 }
 0x327   :  { %1498 = vmatpush.msra.mxu0 %v2993_v26  ;;  %1518 = vmatpush.msra.mxu1 %v2996_v5  ;;  %v3018_v26 = vld [vmem:[#allocation5 + $0x368] sm:$0xff]  ;;  %v3021_v5 = vld [vmem:[#allocation5 + $0x350] sm:$0xff]  ;;  %3708 = vst [vmem:[#allocation28_spill] sm:$0xff] %v3030_v48 }
 0x328   :  { %3704 = vst [vmem:[#allocation24_spill] sm:$0xff] %v3018_v26 }
 0x329   :  { %1499 = vmatpush.msra.mxu0 %v2999_v7  ;;  %1519 = vmatpush.msra.mxu1 %v3002_v1  ;;  %3705 = vst [vmem:[#allocation25_spill] sm:$0xff] %v3021_v5  ;;  %v3024_v7 = vld [vmem:[#allocation5 + $0x358] sm:$0xff]  ;;  %v3027_v1 = vld [vmem:[#allocation5 + $0x340] sm:$0xff] }
 0x32a   :  { %2039 = vmatmul.msk.f32.vlgmr.msra.gmra.mxu0 %vm899_vm3, %v2860_v23  ;;  %2040 = vmatmul.msk.f32.vlgmr.msra.gmra.mxu1 %vm899_vm3, %v2860_v23  ;;  %3706 = vst [vmem:[#allocation26_spill] sm:$0xff] %v3024_v7  ;;  %v3033_v23 = vld [vmem:[#allocation5 + $0x330] sm:$0xff] }
 0x32b   :  { %1608 = vmatpush.msrb.mxu0 %v3005_v52  ;;  %1628 = vmatpush.msrb.mxu1 %v3008_v3  ;;  %3707 = vst [vmem:[#allocation27_spill] sm:$0xff] %v3027_v1  ;;  %v3036_v3 = vld [vmem:[#allocation5 + $0x338] sm:$0xff] }
 0x32c   :  { %3709 = vst [vmem:[#allocation30_spill] sm:$0xff] %v3033_v23 }
 0x32d   :  { %1609 = vmatpush.msrb.mxu0 %v3013_v58  ;;  %1629 = vmatpush.msrb.mxu1 %v3018_v26  ;;  %3710 = vst [vmem:[#allocation32_spill] sm:$0xff] %v3036_v3  ;;  %v3039_v58 = vld [vmem:[#allocation5 + $0x320] sm:$0xff]  ;;  %v3042_v26 = vld [vmem:[#allocation5 + $0x328] sm:$0xff] }
 0x32e   :  { %3711 = vst [vmem:[#allocation34_spill] sm:$0xff] %v3039_v58 }
 0x32f   :  { %1610 = vmatpush.msrb.mxu0 %v3021_v5  ;;  %1630 = vmatpush.msrb.mxu1 %v3024_v7  ;;  %3712 = vst [vmem:[#allocation36_spill] sm:$0xff] %v3042_v26  ;;  %v3045_v5 = vld [vmem:[#allocation5 + $0x310] sm:$0xff]  ;;  %v3048_v7 = vld [vmem:[#allocation5 + $0x318] sm:$0xff] }
 0x330   :  { %3713 = vst [vmem:[#allocation38_spill] sm:$0xff] %v3045_v5 }
 0x331   :  { %1611 = vmatpush.msrb.mxu0 %v3027_v1  ;;  %1631 = vmatpush.msrb.mxu1 %v3030_v48  ;;  %3714 = vst [vmem:[#allocation40_spill] sm:$0xff] %v3048_v7  ;;  %v3051_v1 = vld [vmem:[#allocation5 + $0x300] sm:$0xff]  ;;  %v3054_v48 = vld [vmem:[#allocation5 + $0x308] sm:$0xff] }
 0x332   :  { %3715 = vst [vmem:[#allocation42_spill] sm:$0xff] %v3051_v1 }
 0x333   :  { %1612 = vmatpush.msrb.mxu0 %v3033_v23  ;;  %1632 = vmatpush.msrb.mxu1 %v3036_v3  ;;  %3716 = vst [vmem:[#allocation45_spill] sm:$0xff] %v3054_v48  ;;  %v3057_v23 = vld [vmem:[#allocation5 + $0x3f0] sm:$0xff]  ;;  %v3060_v3 = vld [vmem:[#allocation5 + $0x3f8] sm:$0xff] }
 0x334   :  { %3717 = vst [vmem:[#allocation47_spill] sm:$0xff] %v3060_v3 }
 0x335   :  { %1613 = vmatpush.msrb.mxu0 %v3039_v58  ;;  %1633 = vmatpush.msrb.mxu1 %v3042_v26  ;;  %v3065_v26 = vld [vmem:[#allocation5 + $0x3e0] sm:$0xff]  ;;  %v3082_v58 = vld [vmem:[#allocation5 + $0x3c8] sm:$0xff] }
 0x336   :  { %3718 = vst [vmem:[#allocation49_spill] sm:$0xff] %v3065_v26 }
 0x337   :  { %1614 = vmatpush.msrb.mxu0 %v3045_v5  ;;  %1634 = vmatpush.msrb.mxu1 %v3048_v7  ;;  %v3070_v5 = vld [vmem:[#allocation5 + $0x3e8] sm:$0xff]  ;;  %v3073_v7 = vld [vmem:[#allocation5 + $0x3d0] sm:$0xff]  ;;  %3723 = vst [vmem:[#allocation33_spill] sm:$0xff] %v3082_v58 }
 0x338   :  { %3719 = vst [vmem:[#allocation51_spill] sm:$0xff] %v3070_v5 }
 0x339   :  { %1615 = vmatpush.msrb.mxu0 %v3051_v1  ;;  %1635 = vmatpush.msrb.mxu1 %v3054_v48  ;;  %3720 = vst [vmem:[#allocation29_spill] sm:$0xff] %v3073_v7  ;;  %v3076_v1 = vld [vmem:[#allocation5 + $0x3d8] sm:$0xff]  ;;  %v3079_v48 = vld [vmem:[#allocation5 + $0x3c0] sm:$0xff] }
 0x33a   :  { %2043 = vmatmul.msk.f32.vlgmr.msrb.gmra.mxu0 %vm899_vm3, %v2820_v10  ;;  %2044 = vmatmul.msk.f32.vlgmr.msrb.gmra.mxu1 %vm899_vm3, %v2820_v10  ;;  %3721 = vst [vmem:[#allocation53_spill] sm:$0xff] %v3076_v1  ;;  %v3085_v10 = vld [vmem:[#allocation5 + $0x3b0] sm:$0xff] }
 0x33b   :  { %1724 = vmatpush.msra.mxu0 %v3057_v23  ;;  %1744 = vmatpush.msra.mxu1 %v3060_v3  ;;  %3722 = vst [vmem:[#allocation31_spill] sm:$0xff] %v3079_v48  ;;  %v3088_v3 = vld [vmem:[#allocation5 + $0x3b8] sm:$0xff] }
 0x33d   :  { %1725 = vmatpush.msra.mxu0 %v3065_v26  ;;  %1745 = vmatpush.msra.mxu1 %v3070_v5  ;;  %v3091_v26 = vld [vmem:[#allocation5 + $0x3a0] sm:$0xff]  ;;  %v3094_v5 = vld [vmem:[#allocation5 + $0x3a8] sm:$0xff] }
 0x33e   :  { %3724 = vst [vmem:[#allocation35_spill] sm:$0xff] %v3091_v26 }
 0x33f   :  { %1726 = vmatpush.msra.mxu0 %v3073_v7  ;;  %1746 = vmatpush.msra.mxu1 %v3076_v1  ;;  %v3097_v7 = vld [vmem:[#allocation5 + $0x390] sm:$0xff]  ;;  %v3100_v1 = vld [vmem:[#allocation5 + $0x398] sm:$0xff] }
 0x341   :  { %1727 = vmatpush.msra.mxu0 %v3079_v48  ;;  %1747 = vmatpush.msra.mxu1 %v3082_v58  ;;  %v3103_v48 = vld [vmem:[#allocation5 + $0x380] sm:$0xff]  ;;  %v3106_v58 = vld [vmem:[#allocation5 + $0x388] sm:$0xff] }
 0x342   :  { %3725 = vst [vmem:[#allocation37_spill] sm:$0xff] %v3106_v58 }
 0x343   :  { %1728 = vmatpush.msra.mxu0 %v3085_v10  ;;  %1748 = vmatpush.msra.mxu1 %v3088_v3 }
 0x345   :  { %1729 = vmatpush.msra.mxu0 %v3091_v26  ;;  %1749 = vmatpush.msra.mxu1 %v3094_v5 }
 0x347   :  { %1730 = vmatpush.msra.mxu0 %v3097_v7  ;;  %1750 = vmatpush.msra.mxu1 %v3100_v1 }
 0x349   :  { %1731 = vmatpush.msra.mxu0 %v3103_v48  ;;  %1751 = vmatpush.msra.mxu1 %v3106_v58  ;;  %v1067_v58 = vpop.permute.xlu2 %1066 }
 0x34a   :  { %2047 = vmatmul.msk.f32.vlgmr.msra.gmra.mxu0 %vm899_vm3, %v2849_v17  ;;  %2048 = vmatmul.msk.f32.vlgmr.msra.gmra.mxu1 %vm899_vm3, %v2849_v17  ;;  %v3732_v17 = vld [vmem:[#allocation17_spill] sm:$0xff] }
 0x35b   :  { %v951_v26 = vpop.permute.xlu1 %950 }
 0x35c   :  { %2021 = vmatmul.msk.f32.vlgmr.msra.gmra.mxu2 %vm899_vm3, %v951_v26  ;;  %2022 = vmatmul.msk.f32.vlgmr.msra.gmra.mxu3 %vm899_vm3, %v951_v26  ;;  %v3749_v26 = vld [vmem:[#allocation40_spill] sm:$0xff] }
 0x35d   :  { %1194 = vmatpush.msra.mxu2 %v2778_v62  ;;  %1214 = vmatpush.msra.mxu3 %v2780_v15  ;;  %v1183_v62 = vpop.permute.xlu2 %1182  ;;  %v1299_v15 = vpop.permute.xlu0 %1298 }
 0x35f   :  { %1195 = vmatpush.msra.mxu2 %v2786_v54  ;;  %1215 = vmatpush.msra.mxu3 %v2790_v18 }
 0x361   :  { %1196 = vmatpush.msra.mxu2 %v2795_v50  ;;  %1216 = vmatpush.msra.mxu3 %v2799_v55  ;;  %v3726_v55 = vld [vmem:[#allocation12_spill] sm:$0xff] }
 0x363   :  { %1197 = vmatpush.msra.mxu2 %v2802_v56  ;;  %1217 = vmatpush.msra.mxu3 %v2805_v22  ;;  %v1415_v54 = vpop.permute.xlu1 %1414  ;;  %v3186_v56 = vld [vmem:[%s3515_s8 + $0x78] sm:$0xff] }
 0x364   :  { %2025 = vmatmul.msk.f32.vlgmr.msrb.gmra.mxu2 %vm899_vm3, %v1067_v58  ;;  %2026 = vmatmul.msk.f32.vlgmr.msrb.gmra.mxu3 %vm899_vm3, %v1067_v58  ;;  %v3191_v22 = vld [vmem:[%s3515_s8 + $0xf8] sm:$0xff] }
 0x365   :  { %1198 = vmatpush.msra.mxu2 %v2811_v24  ;;  %1218 = vmatpush.msra.mxu3 %v2813_v60  ;;  %v3727_v24 = vld [vmem:[#allocation11_spill] sm:$0xff]  ;;  %v3728_v60 = vld [vmem:[#allocation13_spill] sm:$0xff]  ;;  %v3748_v58 = vld [vmem:[#allocation38_spill] sm:$0xff] }
 0x366   :  { %v3177_v50 = vpop.f32.mrf.mxu0  ;;  %1851 = vmatpush.msrb.mxu0 %v3186_v56  ;;  %1871 = vmatpush.msrb.mxu1 %v3191_v22 }
 0x367   :  { %1199 = vmatpush.msra.mxu2 %v2822_v28  ;;  %1219 = vmatpush.msra.mxu3 %v2824_v9  ;;  %v3171_v18 = vpop.f32.mrf.mxu1  ;;  %v3200_v28 = vld [vmem:[%s3515_s8 + $0x70] sm:$0xff] }
 0x368   :  { %v3205_v9 = vld [vmem:[%s3515_s8 + $0xf0] sm:$0xff]  ;;  %1852 = vmatpush.msrb.mxu0 %v3200_v28 }
 0x369   :  { %1200 = vmatpush.msra.mxu2 %v2831_v31  ;;  %1220 = vmatpush.msra.mxu3 %v2833_v11  ;;  %v3729_v31 = vld [vmem:[#allocation14_spill] sm:$0xff]  ;;  %v3730_v11 = vld [vmem:[#allocation15_spill] sm:$0xff] }
 0x36a   :  { %1872 = vmatpush.msrb.mxu1 %v3205_v9 }
 0x36b   :  { %1201 = vmatpush.msra.mxu2 %v2837_v12  ;;  %1221 = vmatpush.msra.mxu3 %v2839_v13  ;;  %v3214_v12 = vld [vmem:[%s3515_s8 + $0x68] sm:$0xff] }
 0x36c   :  { %2029 = vmatmul.msk.f32.vlgmr.msra.gmra.mxu2 %vm899_vm3, %v1183_v62  ;;  %2030 = vmatmul.msk.f32.vlgmr.msra.gmra.mxu3 %vm899_vm3, %v1183_v62  ;;  %v3219_v13 = vld [vmem:[%s3515_s8 + $0xe8] sm:$0xff] }
 0x36d   :  { %1310 = vmatpush.msrb.mxu2 %v2843_v14  ;;  %1330 = vmatpush.msrb.mxu3 %v2845_v16  ;;  %v3731_v16 = vld [vmem:[#allocation16_spill] sm:$0xff] }
 0x36e   :  { %1853 = vmatpush.msrb.mxu0 %v3214_v12  ;;  %1873 = vmatpush.msrb.mxu1 %v3219_v13 }
 0x36f   :  { %1311 = vmatpush.msrb.mxu2 %v2851_v19  ;;  %1331 = vmatpush.msrb.mxu3 %v2855_v20  ;;  %v3221_v14 = vpop.f32.mrf.mxu1  ;;  %v3227_v19 = vpop.f32.mrf.mxu0  ;;  %v3232_v20 = vld [vmem:[%s3515_s8 + $0x60] sm:$0xff] }
 0x370   :  { %1854 = vmatpush.msrb.mxu0 %v3232_v20 }
 0x371   :  { %1312 = vmatpush.msrb.mxu2 %v2862_v25  ;;  %1332 = vmatpush.msrb.mxu3 %v2866_v27  ;;  %v3237_v25 = vld [vmem:[%s3515_s8 + $0xe0] sm:$0xff] }
 0x372   :  { %v3733_v27 = vld [vmem:[#allocation18_spill] sm:$0xff]  ;;  %1874 = vmatpush.msrb.mxu1 %v3237_v25 }
 0x373   :  { %1313 = vmatpush.msrb.mxu2 %v2871_v29  ;;  %1333 = vmatpush.msrb.mxu3 %v2874_v32  ;;  %v3734_v29 = vld [vmem:[#allocation19_spill] sm:$0xff]  ;;  %v1531_v32 = vpop.permute.xlu2 %1530 }
 0x375   :  { %1314 = vmatpush.msrb.mxu2 %v2877_v33  ;;  %1334 = vmatpush.msrb.mxu3 %v2880_v34  ;;  %v3735_v33 = vld [vmem:[#allocation20_spill] sm:$0xff]  ;;  %v3736_v34 = vld [vmem:[#allocation21_spill] sm:$0xff] }
 0x377   :  { %1315 = vmatpush.msrb.mxu2 %v2883_v35  ;;  %1335 = vmatpush.msrb.mxu3 %v2886_v36  ;;  %v3248_v35 = vld [vmem:[%s3515_s8 + $0x58] sm:$0xff] }
 0x378   :  { %v3253_v36 = vld [vmem:[%s3515_s8 + $0xd8] sm:$0xff]  ;;  %1855 = vmatpush.msrb.mxu0 %v3248_v35 }
 0x379   :  { %1316 = vmatpush.msrb.mxu2 %v2889_v0  ;;  %1336 = vmatpush.msrb.mxu3 %v2892_v38  ;;  %v3737_v0 = vld [vmem:[#allocation22_spill] sm:$0xff]  ;;  %v3262_v38 = vld [vmem:[%s3515_s8 + $0x50] sm:$0xff] }
 0x37a   :  { %1875 = vmatpush.msrb.mxu1 %v3253_v36  ;;  %1856 = vmatpush.msrb.mxu0 %v3262_v38 }
 0x37b   :  { %1317 = vmatpush.msrb.mxu2 %v2895_v40  ;;  %1337 = vmatpush.msrb.mxu3 %v2898_v42  ;;  %v3267_v40 = vld [vmem:[%s3515_s8 + $0xd0] sm:$0xff]  ;;  %v3738_v42 = vld [vmem:[#allocation23_spill] sm:$0xff] }
 0x37c   :  { %2033 = vmatmul.msk.f32.vlgmr.msrb.gmra.mxu2 %vm899_vm3, %v1299_v15  ;;  %2034 = vmatmul.msk.f32.vlgmr.msrb.gmra.mxu3 %vm899_vm3, %v1299_v15  ;;  %v1647_v15 = vpop.permute.xlu0 %1646 }
 0x37d   :  { %1426 = vmatpush.msra.mxu2 %v2901_v44  ;;  %1446 = vmatpush.msra.mxu3 %v2904_v47  ;;  %v3739_v44 = vld [vmem:[#allocation24_spill] sm:$0xff] }
 0x37e   :  { %v3276_v47 = vld [vmem:[%s3515_s8 + $0x48] sm:$0xff]  ;;  %1876 = vmatpush.msrb.mxu1 %v3267_v40 }
 0x37f   :  { %1427 = vmatpush.msra.mxu2 %v2909_v49  ;;  %1447 = vmatpush.msra.mxu3 %v2914_v51  ;;  %v3281_v49 = vld [vmem:[%s3515_s8 + $0xc8] sm:$0xff]  ;;  %v3283_v51 = vpop.f32.mrf.mxu1 }
 0x380   :  { %1857 = vmatpush.msrb.mxu0 %v3276_v47  ;;  %1877 = vmatpush.msrb.mxu1 %v3281_v49 }
 0x381   :  { %1428 = vmatpush.msra.mxu2 %v2917_v53  ;;  %1448 = vmatpush.msra.mxu3 %v2920_v57  ;;  %v3740_v53 = vld [vmem:[#allocation25_spill] sm:$0xff]  ;;  %v3741_v57 = vld [vmem:[#allocation26_spill] sm:$0xff] }
 0x383   :  { %1429 = vmatpush.msra.mxu2 %v2923_v59  ;;  %1449 = vmatpush.msra.mxu3 %v2926_v61  ;;  %v3292_v59 = vld [vmem:[%s3515_s8 + $0x40] sm:$0xff] }
 0x384   :  { %v3297_v61 = vld [vmem:[%s3515_s8 + $0xc0] sm:$0xff]  ;;  %1858 = vmatpush.msrb.mxu0 %v3292_v59 }
 0x385   :  { %1430 = vmatpush.msra.mxu2 %v2929_v63  ;;  %1450 = vmatpush.msra.mxu3 %v2932_v2  ;;  %v3299_v63 = vpop.f32.mrf.mxu0  ;;  %v3742_v2 = vld [vmem:[#allocation27_spill] sm:$0xff] }
 0x386   :  { %1878 = vmatpush.msrb.mxu1 %v3297_v61 }
 0x387   :  { %1431 = vmatpush.msra.mxu2 %v2935_v4  ;;  %1451 = vmatpush.msra.mxu3 %v2938_v6  ;;  %v3743_v4 = vld [vmem:[#allocation28_spill] sm:$0xff]  ;;  %v3308_v6 = vld [vmem:[%s3515_s8 + $0x38] sm:$0xff] }
 0x388   :  { %1859 = vmatpush.msrb.mxu0 %v3308_v6 }
 0x389   :  { %1432 = vmatpush.msra.mxu2 %v2941_v8  ;;  %1452 = vmatpush.msra.mxu3 %v2944_v21  ;;  %v3313_v8 = vld [vmem:[%s3515_s8 + $0xb8] sm:$0xff] }
 0x38a   :  { %v3744_v21 = vld [vmem:[#allocation30_spill] sm:$0xff]  ;;  %1879 = vmatpush.msrb.mxu1 %v3313_v8 }
 0x38b   :  { %1433 = vmatpush.msra.mxu2 %v2947_v30  ;;  %1453 = vmatpush.msra.mxu3 %v2950_v37  ;;  %v3745_v30 = vld [vmem:[#allocation32_spill] sm:$0xff] }
 0x38c   :  { %2037 = vmatmul.msk.f32.vlgmr.msra.gmra.mxu2 %vm899_vm3, %v1415_v54  ;;  %2038 = vmatmul.msk.f32.vlgmr.msra.gmra.mxu3 %vm899_vm3, %v1415_v54  ;;  %v3322_v37 = vld [vmem:[%s3515_s8 + $0x30] sm:$0xff]  ;;  %v3750_v54 = vld [vmem:[#allocation42_spill] sm:$0xff] }
 0x38d   :  { %1542 = vmatpush.msrb.mxu2 %v2953_v39  ;;  %1562 = vmatpush.msrb.mxu3 %v2956_v41  ;;  %v3327_v39 = vld [vmem:[%s3515_s8 + $0xb0] sm:$0xff]  ;;  %v3746_v41 = vld [vmem:[#allocation34_spill] sm:$0xff]  ;;  %v3349_v62 = vpop.f32.mrf.mxu0 }
 0x38e   :  { %1860 = vmatpush.msrb.mxu0 %v3322_v37  ;;  %1880 = vmatpush.msrb.mxu1 %v3327_v39 }
 0x38f   :  { %1543 = vmatpush.msrb.mxu2 %v2961_v43  ;;  %1563 = vmatpush.msrb.mxu3 %v2966_v45  ;;  %v3747_v43 = vld [vmem:[#allocation36_spill] sm:$0xff] }
 0x390   :  { %v3336_v45 = vld [vmem:[%s3515_s8 + $0x28] sm:$0xff] }
 0x391   :  { %1544 = vmatpush.msrb.mxu2 %v2969_v46  ;;  %1564 = vmatpush.msrb.mxu3 %v3726_v55  ;;  %v3341_v46 = vld [vmem:[%s3515_s8 + $0xa8] sm:$0xff]  ;;  %v3751_v55 = vld [vmem:[#allocation45_spill] sm:$0xff] }
 0x392   :  { %1861 = vmatpush.msrb.mxu0 %v3336_v45  ;;  %1881 = vmatpush.msrb.mxu1 %v3341_v46 }
 0x393   :  { %1545 = vmatpush.msrb.mxu2 %v3727_v24  ;;  %1565 = vmatpush.msrb.mxu3 %v3728_v60  ;;  %v3358_v24 = vld [vmem:[%s3515_s8 + $0x20] sm:$0xff] }
 0x394   :  { %v3363_v60 = vld [vmem:[%s3515_s8 + $0xa0] sm:$0xff]  ;;  %1862 = vmatpush.msrb.mxu0 %v3358_v24 }
 0x395   :  { %1546 = vmatpush.msrb.mxu2 %v3729_v31  ;;  %1566 = vmatpush.msrb.mxu3 %v3730_v11  ;;  %v3752_v31 = vld [vmem:[#allocation47_spill] sm:$0xff]  ;;  %v3372_v11 = vld [vmem:[%s3515_s8 + $0x18] sm:$0xff] }
 0x396   :  { %1882 = vmatpush.msrb.mxu1 %v3363_v60  ;;  %1863 = vmatpush.msrb.mxu0 %v3372_v11 }
 0x397   :  { %1547 = vmatpush.msrb.mxu2 %v3731_v16  ;;  %1567 = vmatpush.msrb.mxu3 %v3732_v17  ;;  %v3377_v16 = vld [vmem:[%s3515_s8 + $0x98] sm:$0xff] }
 0x398   :  { %v3753_v17 = vld [vmem:[#allocation49_spill] sm:$0xff]  ;;  %1883 = vmatpush.msrb.mxu1 %v3377_v16 }
 0x399   :  { %1548 = vmatpush.msrb.mxu2 %v3733_v27  ;;  %1568 = vmatpush.msrb.mxu3 %v3734_v29  ;;  %v3754_v27 = vld [vmem:[#allocation51_spill] sm:$0xff]  ;;  %v3391_v29 = vld [vmem:[%s3515_s8 + $0x90] sm:$0xff] }
 0x39a   :  { %1884 = vmatpush.msrb.mxu1 %v3391_v29 }
 0x39b   :  { %1549 = vmatpush.msrb.mxu2 %v3735_v33  ;;  %1569 = vmatpush.msrb.mxu3 %v3736_v34  ;;  %v3755_v33 = vld [vmem:[#allocation29_spill] sm:$0xff] }
 0x39c   :  { %2041 = vmatmul.msk.f32.vlgmr.msrb.gmra.mxu2 %vm899_vm3, %v1531_v32  ;;  %2042 = vmatmul.msk.f32.vlgmr.msrb.gmra.mxu3 %vm899_vm3, %v1531_v32  ;;  %v3756_v34 = vld [vmem:[#allocation53_spill] sm:$0xff] }
 0x39d   :  { %1658 = vmatpush.msra.mxu2 %v3005_v52  ;;  %1678 = vmatpush.msra.mxu3 %v3737_v0  ;;  %v3343_v52 = vpop.f32.mrf.mxu1  ;;  %v3400_v0 = vld [vmem:[%s3515_s8 + $0x8] sm:$0xff] }
 0x39f   :  { %1659 = vmatpush.msra.mxu2 %v3738_v42  ;;  %1679 = vmatpush.msra.mxu3 %v3739_v44  ;;  %v3405_v42 = vld [vmem:[%s3515_s8 + $0x88] sm:$0xff]  ;;  %v1385_v44 = vpop.f32.mrf.mxu0 }
 0x3a0   :  { %1885 = vmatpush.msrb.mxu1 %v3405_v42 }
 0x3a1   :  { %1660 = vmatpush.msra.mxu2 %v3740_v53  ;;  %1680 = vmatpush.msra.mxu3 %v3741_v57  ;;  %v3757_v53 = vld [vmem:[#allocation31_spill] sm:$0xff]  ;;  %v3758_v57 = vld [vmem:[#allocation33_spill] sm:$0xff] }
 0x3a3   :  { %1661 = vmatpush.msra.mxu2 %v3742_v2  ;;  %1681 = vmatpush.msra.mxu3 %v3743_v4  ;;  %v3414_v2 = vld [vmem:[%s3515_s8] sm:$0xff] }
 0x3a4   :  { %v3419_v4 = vld [vmem:[%s3515_s8 + $0x80] sm:$0xff] }
 0x3a5   :  { %1662 = vmatpush.msra.mxu2 %v3744_v21  ;;  %1682 = vmatpush.msra.mxu3 %v3745_v30  ;;  %v1405_v32 = vpop.f32.mrf.mxu1  ;;  %v945_v21 = vrot.slane %v3171_v18, 7  ;;  %v3759_v30 = vld [vmem:[#allocation35_spill] sm:$0xff] }
 0x3a6   :  { %1886 = vmatpush.msrb.mxu1 %v3419_v4 }
 0x3a7   :  { %1663 = vmatpush.msra.mxu2 %v3746_v41  ;;  %1683 = vmatpush.msra.mxu3 %v3747_v43  ;;  %v1062_v43 = vrot.slane %v3221_v14, 7  ;;  %v947_v18 = vsel %vm946_vm4, %v3177_v50, %v945_v21  ;;  %v1410_v14 = vrot.slane %v1405_v32, 7 }
 0x3a9   :  { %1664 = vmatpush.msra.mxu2 %v3748_v58  ;;  %1684 = vmatpush.msra.mxu3 %v3749_v26  ;;  %v1763_v58 = vpop.permute.xlu1 %1762  ;;  %v3760_v26 = vld [vmem:[#allocation37_spill] sm:$0xff] }
 0x3ab   :  { %1665 = vmatpush.msra.mxu2 %v3750_v54  ;;  %1685 = vmatpush.msra.mxu3 %v3751_v55  ;;  %v1411_v54 = vsel %vm946_vm4, %v1385_v44, %v1410_v14 }
 0x3ac   :  { %2045 = vmatmul.msk.f32.vlgmr.msra.gmra.mxu2 %vm899_vm3, %v1647_v15  ;;  %2046 = vmatmul.msk.f32.vlgmr.msra.gmra.mxu3 %vm899_vm3, %v1647_v15 }
 0x3ad   :  { %1774 = vmatpush.msrb.mxu2 %v3057_v23  ;;  %1794 = vmatpush.msrb.mxu3 %v3752_v31  ;;  %v3386_v23 = vld [vmem:[%s3515_s8 + $0x10] sm:$0xff]  ;;  %v1521_v41 = vpop.f32.mrf.mxu1 }
 0x3ae   :  { %1864 = vmatpush.msrb.mxu0 %v3386_v23 }
 0x3af   :  { %1775 = vmatpush.msrb.mxu2 %v3753_v17  ;;  %1795 = vmatpush.msrb.mxu3 %v3754_v27 }
 0x3b0   :  { %1865 = vmatpush.msrb.mxu0 %v3400_v0 }
 0x3b1   :  { %1776 = vmatpush.msrb.mxu2 %v3755_v33  ;;  %1796 = vmatpush.msrb.mxu3 %v3756_v34 }
 0x3b2   :  { %1866 = vmatpush.msrb.mxu0 %v3414_v2 }
 0x3b3   :  { %1777 = vmatpush.msrb.mxu2 %v3757_v53  ;;  %1797 = vmatpush.msrb.mxu3 %v3758_v57 }
 0x3b5   :  { %1778 = vmatpush.msrb.mxu2 %v3085_v10  ;;  %1798 = vmatpush.msrb.mxu3 %v3088_v3  ;;  %v1501_v10 = vpop.f32.mrf.mxu0  ;;  %v3436_v3 = vld [vmem:[%s3514_s7] sm:$0x3] }
 0x3b6   :  { %v949_v50 = vadd.f32 %v947_v18, %v3436_v3 }
 0x3b7   :  { %1779 = vmatpush.msrb.mxu2 %v3759_v30  ;;  %1799 = vmatpush.msrb.mxu3 %v3094_v5  ;;  %v1178_v5 = vrot.slane %v3283_v51, 7  ;;  %v1637_v15 = vpop.f32.mrf.mxu1 }
 0x3b9   :  { %1780 = vmatpush.msrb.mxu2 %v3097_v7  ;;  %1800 = vmatpush.msrb.mxu3 %v3100_v1  ;;  %v1063_v7 = vsel %vm946_vm4, %v3227_v19, %v1062_v43  ;;  %v1294_v1 = vrot.slane %v3343_v52, 7  ;;  %v1526_v52 = vrot.slane %v1521_v41, 7 }
 0x3ba   :  { %v1065_v51 = vadd.f32 %v1063_v7, %v949_v50 }
 0x3bb   :  { %1781 = vmatpush.msrb.mxu2 %v3103_v48  ;;  %1801 = vmatpush.msrb.mxu3 %v3760_v26  ;;  %v1179_v48 = vsel %vm946_vm4, %v3299_v63, %v1178_v5  ;;  %v1295_v19 = vsel %vm946_vm4, %v3349_v62, %v1294_v1  ;;  %v1642_v63 = vrot.slane %v1637_v15, 7  ;;  %v1845_v15 = vld [vmem:[%s3516_s9] sm:$0x1] }
 0x3bc   :  { %2049 = vmatmul.msk.f32.vlgmr.msrb.gmra.mxu2 %vm899_vm3, %v1763_v58  ;;  %2050 = vmatmul.msk.f32.vlgmr.msrb.gmra.mxu3 %vm899_vm3, %v1763_v58 }
 0x3bd   :  { %1932 = vmatpush.msra.mxu2 %v3186_v56  ;;  %1952 = vmatpush.msra.mxu3 %v3191_v22  ;;  %v1181_v56 = vadd.f32 %v1179_v48, %v1065_v51  ;;  %v1617_v22 = vpop.f32.mrf.mxu0 }
 0x3bf   :  { %1933 = vmatpush.msra.mxu2 %v3200_v28  ;;  %1953 = vmatpush.msra.mxu3 %v3205_v9  ;;  %v1297_v28 = vadd.f32 %v1295_v19, %v1181_v56  ;;  %v1527_v9 = vsel %vm946_vm4, %v1501_v10, %v1526_v52 }
 0x3c1   :  { %1934 = vmatpush.msra.mxu2 %v3214_v12  ;;  %1954 = vmatpush.msra.mxu3 %v3219_v13  ;;  %v1413_v62 = vadd.f32 %v1411_v54, %v1297_v28  ;;  %v1643_v12 = vsel %vm946_vm4, %v1617_v22, %v1642_v63  ;;  %v1926_v54 = vld [vmem:[%s3516_s9] sm:$0x1] }
 0x3c3   :  { %1935 = vmatpush.msra.mxu2 %v3232_v20  ;;  %1955 = vmatpush.msra.mxu3 %v3237_v25  ;;  %v1529_v13 = vadd.f32 %v1527_v9, %v1413_v62 }
 0x3c5   :  { %1936 = vmatpush.msra.mxu2 %v3248_v35  ;;  %1956 = vmatpush.msra.mxu3 %v3253_v36  ;;  %v1645_v20 = vadd.f32 %v1643_v12, %v1529_v13 }
 0x3c7   :  { %1937 = vmatpush.msra.mxu2 %v3262_v38  ;;  %1957 = vmatpush.msra.mxu3 %v3267_v40  ;;  %v1753_v55 = vpop.f32.mrf.mxu1  ;;  %v1733_v25 = vpop.f32.mrf.mxu0 }
 0x3c8   :  { %v1758_v31 = vrot.slane %v1753_v55, 7 }
 0x3c9   :  { %1938 = vmatpush.msra.mxu2 %v3276_v47  ;;  %1958 = vmatpush.msra.mxu3 %v3281_v49 }
 0x3ca   :  { %v1759_v35 = vsel %vm946_vm4, %v1733_v25, %v1758_v31 }
 0x3cb   :  { %1939 = vmatpush.msra.mxu2 %v3292_v59  ;;  %1959 = vmatpush.msra.mxu3 %v3297_v61  ;;  %v1761_v36 = vadd.f32 %v1759_v35, %v1645_v20 }
 0x3cd   :  { %1940 = vmatpush.msra.mxu2 %v3308_v6  ;;  %1960 = vmatpush.msra.mxu3 %v3313_v8  ;;  %v1812_v38 = vmax.f32 %v1761_v36, 0.0 }
 0x3cf   :  { %1941 = vmatpush.msra.mxu2 %v3322_v37  ;;  %1961 = vmatpush.msra.mxu3 %v3327_v39  ;;  %v1847_v40 = vperm.slane %v1812_v38, 0  ;;  %v1848_v47 = vperm.slane %v1812_v38, 1 }
 0x3d1   :  { %1942 = vmatpush.msra.mxu2 %v3336_v45  ;;  %1962 = vmatpush.msra.mxu3 %v3341_v46 }
 0x3d2   :  { %1867 = vmatmul.f32.vlgmr.msrb.gmra.mxu0 %v1847_v40  ;;  %1887 = vmatmul.f32.vlgmr.msrb.gmra.mxu1 %v1848_v47 }
 0x3d3   :  { %1943 = vmatpush.msra.mxu2 %v3358_v24  ;;  %1963 = vmatpush.msra.mxu3 %v3363_v60 }
 0x3d5   :  { %1944 = vmatpush.msra.mxu2 %v3372_v11  ;;  %1964 = vmatpush.msra.mxu3 %v3377_v16 }
 0x3d7   :  { %1945 = vmatpush.msra.mxu2 %v3386_v23  ;;  %1965 = vmatpush.msra.mxu3 %v3391_v29 }
 0x3d9   :  { %1946 = vmatpush.msra.mxu2 %v3400_v0  ;;  %1966 = vmatpush.msra.mxu3 %v3405_v42 }
 0x3db   :  { %1947 = vmatpush.msra.mxu2 %v3414_v2  ;;  %1967 = vmatpush.msra.mxu3 %v3419_v4 }
 0x3df   :  { %v991_v49 = vpop.f32.mrf.mxu3  ;;  %v971_v59 = vpop.f32.mrf.mxu2 }
 0x3e0   :  { %v996_v60 = vrot.slane %v991_v49, 7 }
 0x3e2   :  { %v997_v27 = vsel %vm946_vm4, %v971_v59, %v996_v60 }
 0x3e3   :  { %v999_v33 = vadd.f32 %v997_v27, %v3436_v3 }
 0x3e7   :  { %v1107_v61 = vpop.f32.mrf.mxu3  ;;  %v1087_v6 = vpop.f32.mrf.mxu2 }
 0x3e8   :  { %v1112_v16 = vrot.slane %v1107_v61, 7 }
 0x3ea   :  { %v1113_v29 = vsel %vm946_vm4, %v1087_v6, %v1112_v16 }
 0x3eb   :  { %v1115_v42 = vadd.f32 %v1113_v29, %v999_v33 }
 0x3ef   :  { %v1223_v8 = vpop.f32.mrf.mxu3  ;;  %v1203_v37 = vpop.f32.mrf.mxu2 }
 0x3f0   :  { %v1228_v23 = vrot.slane %v1223_v8, 7 }
 0x3f2   :  { %v1229_v34 = vsel %vm946_vm4, %v1203_v37, %v1228_v23 }
 0x3f3   :  { %v1231_v2 = vadd.f32 %v1229_v34, %v1115_v42 }
 0x3ff   :  { %v1339_v39 = vpop.f32.mrf.mxu3  ;;  %v1319_v45 = vpop.f32.mrf.mxu2 }
 0x400   :  { %v1344_v32 = vrot.slane %v1339_v39, 7 }
 0x402   :  { %v1345_v53 = vsel %vm946_vm4, %v1319_v45, %v1344_v32 }
 0x403   :  { %v1347_v41 = vadd.f32 %v1345_v53, %v1231_v2 }
 0x40f   :  { %v1455_v46 = vpop.f32.mrf.mxu3  ;;  %v1435_v24 = vpop.f32.mrf.mxu2 }
 0x410   :  { %v1460_v0 = vrot.slane %v1455_v46, 7 }
 0x412   :  { %v1461_v21 = vsel %vm946_vm4, %v1435_v24, %v1460_v0 }
 0x413   :  { %v1463_v10 = vadd.f32 %v1461_v21, %v1347_v41 }
 0x41f   :  { %v1571_v11 = vpop.f32.mrf.mxu3  ;;  %v1551_v17 = vpop.f32.mrf.mxu2 }
 0x420   :  { %v1576_v57 = vrot.slane %v1571_v11, 7 }
 0x422   :  { %v1577_v43 = vsel %vm946_vm4, %v1551_v17, %v1576_v57 }
 0x423   :  { %v1579_v3 = vadd.f32 %v1577_v43, %v1463_v10 }
 0x42f   :  { %v1687_v44 = vpop.f32.mrf.mxu3  ;;  %v1667_v4 = vpop.f32.mrf.mxu2 }
 0x430   :  { %v1692_v30 = vrot.slane %v1687_v44, 7 }
 0x432   :  { %v1693_v18 = vsel %vm946_vm4, %v1667_v4, %v1692_v30 }
 0x433   :  { %v1695_v26 = vadd.f32 %v1693_v18, %v1579_v3 }
 0x43f   :  { %v1803_v58 = vpop.f32.mrf.mxu3  ;;  %v1783_v7 = vpop.f32.mrf.mxu2 }
 0x440   :  { %v1808_v5 = vrot.slane %v1803_v58, 7 }
 0x442   :  { %v1809_v1 = vsel %vm946_vm4, %v1783_v7, %v1808_v5 }
 0x443   :  { %v1811_v50 = vadd.f32 %v1809_v1, %v1695_v26 }
 0x445   :  { %v1893_v48 = vmax.f32 %v1811_v50, 0.0 }
 0x447   :  { %v1928_v14 = vperm.slane %v1893_v48, 0  ;;  %v1929_v51 = vperm.slane %v1893_v48, 1 }
 0x449   :  { %1948 = vmatmul.f32.vlgmr.msra.gmra.mxu2 %v1928_v14  ;;  %1968 = vmatmul.f32.vlgmr.msra.gmra.mxu3 %v1929_v51 }
 0x44f   :  { %v1868_v19 = vpop.f32.mrf.mxu0  ;;  %v1888_v56 = vpop.f32.mrf.mxu1 }
 0x450   :  { %v1869_v52 = vadd.f32 %v1868_v19, %v1845_v15 }
 0x452   :  { %v1889_v22 = vadd.f32 %v1888_v56, %v1869_v52 }
 0x454   :  { %1892 = vst.msk [vmem:[#allocation7] sm:$0x1] %vm1891_vm5, %v1889_v22 }
 0x4cc   :  { %v1949_v63 = vpop.f32.mrf.mxu2  ;;  %v1969_v9 = vpop.f32.mrf.mxu3 }
 0x4cd   :  { %v1950_v28 = vadd.f32 %v1949_v63, %v1926_v54 }
 0x4cf   :  { %v1970_v62 = vadd.f32 %v1969_v9, %v1950_v28 }
 0x4d1   :  { %1972 = vst.msk [vmem:[#allocation7 + $0x1] sm:$0x1] %vm1891_vm5, %v1970_v62 }
 0x4d2   :  { %1983 = dma.vmem_to_hbm [thread:$0]  %s1979_s28, 32, %s1981_s11, [#allocation4]  }
 0x4d3   :  { %2138 = dma.done.wait [#allocation4], 32  }
 0x4d4   :  { %2139 = vsyncadd [#allocation4], 4294967264 }
 0x4d5   :  { %1988 = vsyncpa [#allocation3], 1 }
 0x4d6   :  { %1989 = vsyncpa [#allocation6], 1 }
 0x4d7   :  { %1990 = vsyncpa [#allocation4], 1 }

</bundles_post_ra>
